<compile_context>
chip_gen: v7x
topology: tpu7x:2x2x1
jax: 0.10.0
libtpu: 0.0.40
codegen_flags: <defaults>
</compile_context>

<pallas_src>
import functools

import jax
import jax.numpy as jnp
from jax.experimental import pallas as pl
from jax.experimental.pallas import tpu as pltpu

F32 = jnp.float32
BF16 = jnp.bfloat16


# -----------------------------------------------------------------------------
# Fused kernel: Gaussian edge prologue + L message-passing layers, per batch.
# Grid = (B, L); node/edge outputs are VMEM-resident accumulators across L.
# -----------------------------------------------------------------------------
def _fused_gnn_kernel(
    ab_ref,                                     # SMEM (L, 2): [alpha, beta] per layer
    coeff_ref,                                  # SMEM (1, 1): Gaussian -0.5/width^2
    node_in_ref,                                # (1, At, F)        f32
    r_ref,                                      # (1, At*Nbr, 1)    f32
    mu_ref,                                     # (1, E)            f32
    onehot_ref,                                 # (1, At*Nbr, At)   bf16 (neighbor gather)
    mask_ref,                                   # (1, At*Nbr, 1)    f32
    wef_ref, bf_ref,                            # (1, E, F+E) bf16, (1, 1, F) f32
    win_ref, bin_ref,                           # (1, F, F)   bf16, (1, 1, F) f32
    wout_ref, bout_ref,                         # (1, F, F)   bf16, (1, 1, F) f32
    we12_ref, be_ref,                           # (1, F, 2E)  bf16, (1, 1, E) f32
    node_out_ref,                               # (1, At, F)        f32 (resident state)
    edge_out_ref,                               # (1, At*Nbr, E)    f32 (resident state)
    *, At, Nbr, F, E):
    l = pl.program_id(1)

    # ---- layer 0: initialize the resident state (prologue fused in) ----
    @pl.when(l == 0)
    def _():
        node_out_ref[0] = node_in_ref[0]
        coeff = coeff_ref[0, 0]
        diff = r_ref[0] - mu_ref[...]                       # (At*Nbr, E) f32
        edge_out_ref[0] = jnp.exp(coeff * diff * diff)      # Gaussian smearing in f32

    alpha = ab_ref[l, 0]
    beta = ab_ref[l, 1]

    x = node_out_ref[0]                                     # (At, F)      f32
    e = edge_out_ref[0]                                     # (At*Nbr, E)  f32
    onehot = onehot_ref[0]                                  # (At*Nbr, At) bf16
    mask = mask_ref[0]                                      # (At*Nbr, 1)  f32

    x_bf = x.astype(BF16)
    e_bf = e.astype(BF16)

    # --- fused edge-state projection: [cfconv filter | edge-refresh term] ---
    e_proj = jnp.dot(e_bf, wef_ref[0], preferred_element_type=F32)     # (At*Nbr, F+E)
    filt = jax.nn.softplus(e_proj[:, :F] + bf_ref[0])                  # (At*Nbr, F)
    e3_term = e_proj[:, F:]                                            # (At*Nbr, E)

    # --- node message: project per atom, then one-hot gather per pair ---
    hp = jnp.dot(x_bf, win_ref[0], preferred_element_type=F32)         # (At, F)
    h = jnp.dot(onehot, hp.astype(BF16),
                preferred_element_type=F32) + bin_ref[0]               # (At*Nbr, F)
    msg = filt * h * mask                                              # (At*Nbr, F)
    # neighbor pooling: sublane (XLU/VPU) reduce instead of a one-hot matmul
    agg = jnp.sum(msg.reshape(At, Nbr, F), axis=1)                     # (At, F)
    upd = jnp.dot(jax.nn.softplus(agg).astype(BF16), wout_ref[0],
                  preferred_element_type=F32) + bout_ref[0]            # (At, F)
    x_new = alpha * x + beta * upd                                     # f32 reservoir blend
    node_out_ref[0] = x_new

    # --- edge refresh: project per atom once, then repeat / gather per pair ---
    proj = jnp.dot(x_new.astype(BF16), we12_ref[0],
                   preferred_element_type=F32)                         # (At, 2E)
    proj_i = proj[:, :E]                                               # center-atom term
    proj_j = proj[:, E:]                                               # neighbor term
    x_i_term = jnp.broadcast_to(
        proj_i[:, None, :], (At, Nbr, E)).reshape(At * Nbr, E)         # sublane repeat
    x_j_term = jnp.dot(onehot, proj_j.astype(BF16),
                       preferred_element_type=F32)                     # (At*Nbr, E)
    e_upd = jax.nn.softplus(x_i_term + x_j_term + e3_term + be_ref[0])
    # masked neighbors contribute nothing (invariant preserved from reference)
    edge_out_ref[0] = e + mask * e_upd


# -----------------------------------------------------------------------------
# Parameter init (deterministic, synthetic). Weights stacked over layers.
# -----------------------------------------------------------------------------
def init_params(key, n_node_feature, n_edge_feature, n_message_passing,
                gaussian_filter_end=5.5, max_z=100):
    F, E, L = n_node_feature, n_edge_feature, n_message_passing
    keys = jax.random.split(key, 1 + 6 * L)
    params = {}
    params["embedding"] = 0.1 * jax.random.normal(keys[0], (max_z, F), F32)
    params["offsets"] = jnp.linspace(
        0.0, gaussian_filter_end, E, dtype=F32).reshape(1, E)
    width = gaussian_filter_end / (E - 1)
    params["coeff"] = float(-0.5 / width ** 2)

    def dense(k, fan_in, fan_out):
        return (jax.random.normal(k, (fan_in, fan_out), F32)
                * (1.0 / (fan_in ** 0.5))).astype(BF16)

    wf, win, wout, we1, we2, we3 = [], [], [], [], [], []
    ki = 1
    for _ in range(L):
        wf.append(dense(keys[ki + 0], E, F))
        win.append(dense(keys[ki + 1], F, F))
        wout.append(dense(keys[ki + 2], F, F))
        we1.append(dense(keys[ki + 3], F, E))
        we2.append(dense(keys[ki + 4], F, E))
        we3.append(dense(keys[ki + 5], E, E))
        ki += 6

    params["stacked"] = {
        "wf": jnp.stack(wf),   "bf": jnp.zeros((L, 1, F), F32),
        "win": jnp.stack(win), "bin": jnp.zeros((L, 1, F), F32),
        "wout": jnp.stack(wout), "bout": jnp.zeros((L, 1, F), F32),
        "we1": jnp.stack(we1), "we2": jnp.stack(we2), "we3": jnp.stack(we3),
        "be": jnp.zeros((L, 1, E), F32),
    }
    return params


# -----------------------------------------------------------------------------
# GraphToFeatures.forward
# -----------------------------------------------------------------------------
@jax.jit
def graph_to_features(inputs, conductance, params):
    z = inputs["Z"]                       # (B, At) int
    nbr_idx = inputs["neighbors"]         # (B, At, Nbr) int
    nbr_mask = inputs["neighbor_mask"]    # (B, At, Nbr) f32
    r_ij = inputs["distances"]            # (B, At, Nbr) f32

    B, At, Nbr = nbr_idx.shape
    F = params["embedding"].shape[-1]
    E = params["offsets"].shape[-1]
    sw = params["stacked"]
    L = sw["wf"].shape[0]
    at_nbr = At * Nbr

    # initial node embedding: table lookup (glue, plain JAX)
    node0 = jnp.take(params["embedding"], z, axis=0).astype(F32)        # (B, At, F)
    r_flat = r_ij.reshape(B, at_nbr, 1).astype(F32)
    mask_flat = nbr_mask.reshape(B, at_nbr, 1).astype(F32)
    # neighbor gather one-hot: built once, shared by all layers (bf16 for MXU)
    onehot = (nbr_idx.reshape(B, at_nbr, 1).astype(jnp.int32)
              == jnp.arange(At, dtype=jnp.int32).reshape(1, 1, At)).astype(BF16)

    # per-layer (alpha, beta): reservoir layers blend with conductance,
    # final MessagePassing layer uses residual update (1, 1).
    c = conductance.astype(F32)
    alphas = jnp.concatenate([1.0 - c, jnp.ones((1,), F32)])
    betas = jnp.concatenate([c, jnp.ones((1,), F32)])
    ab = jnp.stack([alphas, betas], axis=1)                             # (L, 2)
    coeff = jnp.reshape(jnp.asarray(params["coeff"], F32), (1, 1))      # SMEM scalar

    # concat weights that consume the same activation -> one wider MXU pass
    wef = jnp.concatenate([sw["wf"], sw["we3"]], axis=-1)               # (L, E, F+E)
    we12 = jnp.concatenate([sw["we1"], sw["we2"]], axis=-1)             # (L, F, 2E)

    weights = (wef, sw["bf"], sw["win"], sw["bin"], sw["wout"], sw["bout"],
               we12, sw["be"])
    w_specs = [pl.BlockSpec((1,) + w.shape[1:], lambda b, l: (l, 0, 0))
               for w in weights]

    node_out, edge_out = pl.pallas_call(
        functools.partial(_fused_gnn_kernel, At=At, Nbr=Nbr, F=F, E=E),
        grid=(B, L),
        in_specs=[
            pl.BlockSpec(memory_space=pltpu.MemorySpace.SMEM),           # ab
            pl.BlockSpec(memory_space=pltpu.MemorySpace.SMEM),           # coeff
            pl.BlockSpec((1, At, F), lambda b, l: (b, 0, 0)),            # node0
            pl.BlockSpec((1, at_nbr, 1), lambda b, l: (b, 0, 0)),        # r
            pl.BlockSpec((1, E), lambda b, l: (0, 0)),                   # mu (offsets)
            pl.BlockSpec((1, at_nbr, At), lambda b, l: (b, 0, 0)),       # onehot
            pl.BlockSpec((1, at_nbr, 1), lambda b, l: (b, 0, 0)),        # mask
        ] + w_specs,
        out_specs=[
            pl.BlockSpec((1, At, F), lambda b, l: (b, 0, 0)),            # node (resident)
            pl.BlockSpec((1, at_nbr, E), lambda b, l: (b, 0, 0)),        # edge (resident)
        ],
        out_shape=(
            jax.ShapeDtypeStruct((B, At, F), F32),
            jax.ShapeDtypeStruct((B, at_nbr, E), F32),
        ),
        compiler_params=pltpu.CompilerParams(
            dimension_semantics=("parallel", "arbitrary")),
    )(ab, coeff, node0, r_flat, params["offsets"], onehot, mask_flat, *weights)

    return node_out, edge_out.reshape(B, At, Nbr, E)


# -----------------------------------------------------------------------------
# Pure-JAX f32 reference (same math, no re-association / bf16 activations).
# -----------------------------------------------------------------------------
def graph_to_features_ref(inputs, conductance, params):
    z = inputs["Z"]
    nbr_idx = inputs["neighbors"]
    nbr_mask = inputs["neighbor_mask"]
    r_ij = inputs["distances"]
    B, At, Nbr = nbr_idx.shape
    sw = params["stacked"]
    L = sw["wf"].shape[0]
    F = params["embedding"].shape[-1]
    E = params["offsets"].shape[-1]
    at_nbr = At * Nbr

    x = jnp.take(params["embedding"], z, axis=0).astype(F32)
    diff = r_ij.reshape(B, at_nbr, 1).astype(F32) - params["offsets"].reshape(1, 1, E)
    e = jnp.exp(params["coeff"] * diff * diff)
    mask = nbr_mask.reshape(B, at_nbr, 1).astype(F32)
    idx = nbr_idx.reshape(B, at_nbr)

    c = conductance.astype(F32)
    alphas = jnp.concatenate([1.0 - c, jnp.ones((1,), F32)])
    betas = jnp.concatenate([c, jnp.ones((1,), F32)])
    gather = jax.vmap(lambda a, i: a[i])

    for l in range(L):
        wf = sw["wf"][l].astype(F32); bf = sw["bf"][l]
        win = sw["win"][l].astype(F32); bi = sw["bin"][l]
        wout = sw["wout"][l].astype(F32); bo = sw["bout"][l]
        we1 = sw["we1"][l].astype(F32); we2 = sw["we2"][l].astype(F32)
        we3 = sw["we3"][l].astype(F32); be = sw["be"][l]

        filt = jax.nn.softplus(e @ wf + bf)
        h = gather(x, idx) @ win + bi
        msg = filt * h * mask
        agg = msg.reshape(B, At, Nbr, F).sum(axis=2)
        upd = jax.nn.softplus(agg) @ wout + bo
        x = alphas[l] * x + betas[l] * upd
        x_i = jnp.repeat(x, Nbr, axis=1)
        e_upd = jax.nn.softplus(x_i @ we1 + gather(x, idx) @ we2 + e @ we3 + be)
        e = e + mask * e_upd
    return x, e.reshape(B, At, Nbr, E)


if __name__ == "__main__":
    B, At, Nbr = 2, 8, 4
    F, E = 128, 128          # lane-dense feature widths (multiples of 128)
    n_message_passing = 3

    key = jax.random.PRNGKey(0)
    k_p, k_z, k_idx, k_r, k_m, k_c = jax.random.split(key, 6)
    params = init_params(k_p, F, E, n_message_passing)

    z = jax.random.randint(k_z, (B, At), 1, 10)
    nbr_idx = jax.random.randint(k_idx, (B, At, Nbr), 0, At)
    r_ij = jax.random.uniform(k_r, (B, At, Nbr), F32, 0.8, 5.0)
    nbr_mask = (jax.random.uniform(k_m, (B, At, Nbr)) > 0.2).astype(F32)
    conductance = jax.random.uniform(k_c, (n_message_passing - 1,), F32, 0.1, 0.9)

    inputs = {"Z": z, "neighbors": nbr_idx, "neighbor_mask": nbr_mask,
              "distances": r_ij}

    node_out, edge_out = graph_to_features(inputs, conductance, params)
    jax.block_until_ready((node_out, edge_out))

    assert node_out.shape == (B, At, F)
    assert edge_out.shape == (B, At, Nbr, E)
    assert bool(jnp.all(jnp.isfinite(node_out)))
    assert bool(jnp.all(jnp.isfinite(edge_out)))

    # loose tolerance: kernel uses bf16 MXU activations, reference is pure f32
    node_ref, edge_ref = graph_to_features_ref(inputs, conductance, params)
    assert bool(jnp.allclose(node_out, node_ref, rtol=0.1, atol=0.1))
    assert bool(jnp.allclose(edge_out, edge_ref, rtol=0.1, atol=0.1))

    print("KERNEL_OK")
</pallas_src>

<mosaic_0001>
module attributes {stable_mosaic.version = 11 : i64} {
  func.func @_fused_gnn_kernel(%arg0: i32, %arg1: i32, %arg2: memref<3x2xf32, #tpu.memory_space<smem>>, %arg3: memref<1x1xf32, #tpu.memory_space<smem>>, %arg4: memref<1x8x128xf32, #tpu.memory_space<vmem>>, %arg5: memref<1x32x1xf32, #tpu.memory_space<vmem>>, %arg6: memref<1x128xf32, #tpu.memory_space<vmem>>, %arg7: memref<1x32x8xbf16, #tpu.memory_space<vmem>>, %arg8: memref<1x32x1xf32, #tpu.memory_space<vmem>>, %arg9: memref<1x128x256xbf16, #tpu.memory_space<vmem>>, %arg10: memref<1x1x128xf32, #tpu.memory_space<vmem>>, %arg11: memref<1x128x128xbf16, #tpu.memory_space<vmem>>, %arg12: memref<1x1x128xf32, #tpu.memory_space<vmem>>, %arg13: memref<1x128x128xbf16, #tpu.memory_space<vmem>>, %arg14: memref<1x1x128xf32, #tpu.memory_space<vmem>>, %arg15: memref<1x128x256xbf16, #tpu.memory_space<vmem>>, %arg16: memref<1x1x128xf32, #tpu.memory_space<vmem>>, %arg17: memref<1x8x128xf32, #tpu.memory_space<vmem>>, %arg18: memref<1x32x128xf32, #tpu.memory_space<vmem>>) attributes {dimension_semantics = [#tpu.dimension_semantics<parallel>, #tpu.dimension_semantics<arbitrary>], iteration_bounds = array<i64: 2, 3>, scalar_prefetch = 0 : i64, scratch_operands = 0 : i64, tpu.core_type = #tpu.core_type<tc>, window_params = [{transform_indices = @transform_0, window_bounds = array<i64: 3, 2>}, {transform_indices = @transform_1, window_bounds = array<i64: 1, 1>}, {transform_indices = @transform_2, window_bounds = array<i64: 1, 8, 128>}, {transform_indices = @transform_3, window_bounds = array<i64: 1, 32, 1>}, {pipeline_mode = #tpu.pipeline_mode<synchronous>, transform_indices = @transform_4, window_bounds = array<i64: 1, 128>}, {transform_indices = @transform_5, window_bounds = array<i64: 1, 32, 8>}, {transform_indices = @transform_6, window_bounds = array<i64: 1, 32, 1>}, {transform_indices = @transform_7, window_bounds = array<i64: 1, 128, 256>}, {transform_indices = @transform_8, window_bounds = array<i64: 1, 1, 128>}, {transform_indices = @transform_9, window_bounds = array<i64: 1, 128, 128>}, {transform_indices = @transform_10, window_bounds = array<i64: 1, 1, 128>}, {transform_indices = @transform_11, window_bounds = array<i64: 1, 128, 128>}, {transform_indices = @transform_12, window_bounds = array<i64: 1, 1, 128>}, {transform_indices = @transform_13, window_bounds = array<i64: 1, 128, 256>}, {transform_indices = @transform_14, window_bounds = array<i64: 1, 1, 128>}, {transform_indices = @transform_15, window_bounds = array<i64: 1, 8, 128>}, {transform_indices = @transform_16, window_bounds = array<i64: 1, 32, 128>}]} {
    %c0_i32 = arith.constant 0 : i32
    %0 = arith.cmpi eq, %arg1, %c0_i32 : i32
    %1 = arith.extui %0 : i1 to i32
    %c0_i32_0 = arith.constant 0 : i32
    %2 = arith.cmpi ne, %1, %c0_i32_0 : i32
    scf.if %2 {
      %c0_55 = arith.constant 0 : index
      %c0_56 = arith.constant 0 : index
      %c0_57 = arith.constant 0 : index
      %122 = vector.load %arg4[%c0_55, %c0_56, %c0_57] : memref<1x8x128xf32, #tpu.memory_space<vmem>>, vector<1x8x128xf32>
      %123 = vector.shape_cast %122 : vector<1x8x128xf32> to vector<8x128xf32>
      %c0_58 = arith.constant 0 : index
      %c0_59 = arith.constant 0 : index
      %c0_60 = arith.constant 0 : index
      %124 = vector.load %arg17[%c0_58, %c0_59, %c0_60] : memref<1x8x128xf32, #tpu.memory_space<vmem>>, vector<1x8x128xf32>
      %125 = vector.shape_cast %124 : vector<1x8x128xf32> to vector<8x128xf32>
      %126 = vector.shape_cast %123 : vector<8x128xf32> to vector<1x8x128xf32>
      tpu.vector_store %arg17[%c0_58, %c0_59, %c0_60], %126 {strides = array<i32>} : memref<1x8x128xf32, #tpu.memory_space<vmem>>, vector<1x8x128xf32>,
      %c0_61 = arith.constant 0 : index
      %c0_62 = arith.constant 0 : index
      %127 = memref.load %arg3[%c0_61, %c0_62] : memref<1x1xf32, #tpu.memory_space<smem>>
      %c0_63 = arith.constant 0 : index
      %c0_64 = arith.constant 0 : index
      %c0_65 = arith.constant 0 : index
      %128 = vector.load %arg5[%c0_63, %c0_64, %c0_65] : memref<1x32x1xf32, #tpu.memory_space<vmem>>, vector<1x32x1xf32>
      %129 = vector.shape_cast %128 : vector<1x32x1xf32> to vector<32x1xf32>
      %c0_66 = arith.constant 0 : index
      %c0_67 = arith.constant 0 : index
      %130 = vector.load %arg6[%c0_66, %c0_67] : memref<1x128xf32, #tpu.memory_space<vmem>>, vector<1x128xf32>
      %131 = vector.broadcast %129 : vector<32x1xf32> to vector<32x128xf32>
      %132 = vector.broadcast %130 : vector<1x128xf32> to vector<32x128xf32>
      %133 = arith.subf %131, %132 : vector<32x128xf32>
      %134 = vector.broadcast %127 : f32 to vector<32x128xf32>
      %135 = arith.mulf %134, %133 : vector<32x128xf32>
      %136 = arith.mulf %135, %133 : vector<32x128xf32>
      %137 = math.exp %136 : vector<32x128xf32>
      %c0_68 = arith.constant 0 : index
      %c0_69 = arith.constant 0 : index
      %c0_70 = arith.constant 0 : index
      %138 = vector.load %arg18[%c0_68, %c0_69, %c0_70] : memref<1x32x128xf32, #tpu.memory_space<vmem>>, vector<1x32x128xf32>
      %139 = vector.shape_cast %138 : vector<1x32x128xf32> to vector<32x128xf32>
      %140 = vector.shape_cast %137 : vector<32x128xf32> to vector<1x32x128xf32>
      tpu.vector_store %arg18[%c0_68, %c0_69, %c0_70], %140 {strides = array<i32>} : memref<1x32x128xf32, #tpu.memory_space<vmem>>, vector<1x32x128xf32>,
    } else {
    }
    %3 = arith.index_cast %arg1 : i32 to index
    %c0 = arith.constant 0 : index
    %4 = memref.load %arg2[%3, %c0] : memref<3x2xf32, #tpu.memory_space<smem>>
    %5 = arith.index_cast %arg1 : i32 to index
    %c1 = arith.constant 1 : index
    %6 = memref.load %arg2[%5, %c1] : memref<3x2xf32, #tpu.memory_space<smem>>
    %c0_1 = arith.constant 0 : index
    %c0_2 = arith.constant 0 : index
    %c0_3 = arith.constant 0 : index
    %7 = vector.load %arg17[%c0_1, %c0_2, %c0_3] : memref<1x8x128xf32, #tpu.memory_space<vmem>>, vector<1x8x128xf32>
    %8 = vector.shape_cast %7 : vector<1x8x128xf32> to vector<8x128xf32>
    %c0_4 = arith.constant 0 : index
    %c0_5 = arith.constant 0 : index
    %c0_6 = arith.constant 0 : index
    %9 = vector.load %arg18[%c0_4, %c0_5, %c0_6] : memref<1x32x128xf32, #tpu.memory_space<vmem>>, vector<1x32x128xf32>
    %10 = vector.shape_cast %9 : vector<1x32x128xf32> to vector<32x128xf32>
    %c0_7 = arith.constant 0 : index
    %c0_8 = arith.constant 0 : index
    %c0_9 = arith.constant 0 : index
    %11 = vector.load %arg7[%c0_7, %c0_8, %c0_9] : memref<1x32x8xbf16, #tpu.memory_space<vmem>>, vector<1x32x8xbf16>
    %12 = vector.shape_cast %11 : vector<1x32x8xbf16> to vector<32x8xbf16>
    %c0_10 = arith.constant 0 : index
    %c0_11 = arith.constant 0 : index
    %c0_12 = arith.constant 0 : index
    %13 = vector.load %arg8[%c0_10, %c0_11, %c0_12] : memref<1x32x1xf32, #tpu.memory_space<vmem>>, vector<1x32x1xf32>
    %14 = vector.shape_cast %13 : vector<1x32x1xf32> to vector<32x1xf32>
    %15 = arith.truncf %8 : vector<8x128xf32> to vector<8x128xbf16>
    %16 = arith.truncf %10 : vector<32x128xf32> to vector<32x128xbf16>
    %c0_13 = arith.constant 0 : index
    %c0_14 = arith.constant 0 : index
    %c0_15 = arith.constant 0 : index
    %17 = vector.load %arg9[%c0_13, %c0_14, %c0_15] : memref<1x128x256xbf16, #tpu.memory_space<vmem>>, vector<1x128x256xbf16>
    %18 = vector.shape_cast %17 : vector<1x128x256xbf16> to vector<128x256xbf16>
    %cst = arith.constant dense<0.000000e+00> : vector<32x256xf32>
    %19 = tpu.matmul %16, %18, %cst {dimension_numbers = #tpu.dot_dimension_numbers<[1], [0], [0], [1], [0, 0, 1, 1], [], []>} : vector<32x128xbf16>, vector<128x256xbf16>, vector<32x256xf32> -> vector<32x256xf32>
    %20 = vector.extract_strided_slice %19 {offsets = [0, 0], sizes = [32, 128], strides = [1, 1]} : vector<32x256xf32> to vector<32x128xf32>
    %c0_16 = arith.constant 0 : index
    %c0_17 = arith.constant 0 : index
    %c0_18 = arith.constant 0 : index
    %21 = vector.load %arg10[%c0_16, %c0_17, %c0_18] : memref<1x1x128xf32, #tpu.memory_space<vmem>>, vector<1x1x128xf32>
    %22 = vector.shape_cast %21 : vector<1x1x128xf32> to vector<1x128xf32>
    %23 = vector.broadcast %22 : vector<1x128xf32> to vector<32x128xf32>
    %24 = arith.addf %20, %23 : vector<32x128xf32>
    %cst_19 = arith.constant 0.000000e+00 : f32
    %25 = vector.broadcast %cst_19 : f32 to vector<32x128xf32>
    %26 = arith.maximumf %24, %25 : vector<32x128xf32>
    %27 = vector.broadcast %cst_19 : f32 to vector<32x128xf32>
    %28 = arith.subf %24, %27 : vector<32x128xf32>
    %29 = arith.cmpf one, %28, %28 : vector<32x128xf32>
    %30 = vector.broadcast %cst_19 : f32 to vector<32x128xf32>
    %31 = arith.addf %24, %30 : vector<32x128xf32>
    %32 = math.absf %28 : vector<32x128xf32>
    %cst_20 = arith.constant 0.000000e+00 : f32
    %33 = vector.broadcast %cst_20 : f32 to vector<32x128xf32>
    %34 = arith.subf %33, %32 : vector<32x128xf32>
    %35 = math.exp %34 : vector<32x128xf32>
    %36 = math.log1p %35 : vector<32x128xf32>
    %37 = arith.addf %26, %36 : vector<32x128xf32>
    %38 = arith.select %29, %31, %37 : vector<32x128xi1>, vector<32x128xf32>
    %39 = vector.extract_strided_slice %19 {offsets = [0, 128], sizes = [32, 128], strides = [1, 1]} : vector<32x256xf32> to vector<32x128xf32>
    %c0_21 = arith.constant 0 : index
    %c0_22 = arith.constant 0 : index
    %c0_23 = arith.constant 0 : index
    %40 = vector.load %arg11[%c0_21, %c0_22, %c0_23] : memref<1x128x128xbf16, #tpu.memory_space<vmem>>, vector<1x128x128xbf16>
    %41 = vector.shape_cast %40 : vector<1x128x128xbf16> to vector<128x128xbf16>
    %cst_24 = arith.constant dense<0.000000e+00> : vector<8x128xf32>
    %42 = tpu.matmul %15, %41, %cst_24 {dimension_numbers = #tpu.dot_dimension_numbers<[1], [0], [0], [1], [0, 0, 1, 1], [], []>} : vector<8x128xbf16>, vector<128x128xbf16>, vector<8x128xf32> -> vector<8x128xf32>
    %43 = arith.truncf %42 : vector<8x128xf32> to vector<8x128xbf16>
    %cst_25 = arith.constant dense<0.000000e+00> : vector<32x128xf32>
    %44 = tpu.matmul %12, %43, %cst_25 {dimension_numbers = #tpu.dot_dimension_numbers<[1], [0], [0], [1], [0, 0, 1, 1], [], []>} : vector<32x8xbf16>, vector<8x128xbf16>, vector<32x128xf32> -> vector<32x128xf32>
    %c0_26 = arith.constant 0 : index
    %c0_27 = arith.constant 0 : index
    %c0_28 = arith.constant 0 : index
    %45 = vector.load %arg12[%c0_26, %c0_27, %c0_28] : memref<1x1x128xf32, #tpu.memory_space<vmem>>, vector<1x1x128xf32>
    %46 = vector.shape_cast %45 : vector<1x1x128xf32> to vector<1x128xf32>
    %47 = vector.broadcast %46 : vector<1x128xf32> to vector<32x128xf32>
    %48 = arith.addf %44, %47 : vector<32x128xf32>
    %49 = arith.mulf %38, %48 : vector<32x128xf32>
    %50 = vector.broadcast %14 : vector<32x1xf32> to vector<32x128xf32>
    %51 = arith.mulf %49, %50 : vector<32x128xf32>
    %52 = vector.shape_cast %51 : vector<32x128xf32> to vector<8x4x128xf32>
    %cst_29 = arith.constant dense<0.000000e+00> : vector<8x128xf32>
    %53 = vector.multi_reduction <add>, %52, %cst_29 [1] : vector<8x4x128xf32> to vector<8x128xf32>
    %cst_30 = arith.constant 0.000000e+00 : f32
    %54 = vector.broadcast %cst_30 : f32 to vector<8x128xf32>
    %55 = arith.maximumf %53, %54 : vector<8x128xf32>
    %56 = vector.broadcast %cst_30 : f32 to vector<8x128xf32>
    %57 = arith.subf %53, %56 : vector<8x128xf32>
    %58 = arith.cmpf one, %57, %57 : vector<8x128xf32>
    %59 = vector.broadcast %cst_30 : f32 to vector<8x128xf32>
    %60 = arith.addf %53, %59 : vector<8x128xf32>
    %61 = math.absf %57 : vector<8x128xf32>
    %cst_31 = arith.constant 0.000000e+00 : f32
    %62 = vector.broadcast %cst_31 : f32 to vector<8x128xf32>
    %63 = arith.subf %62, %61 : vector<8x128xf32>
    %64 = math.exp %63 : vector<8x128xf32>
    %65 = math.log1p %64 : vector<8x128xf32>
    %66 = arith.addf %55, %65 : vector<8x128xf32>
    %67 = arith.select %58, %60, %66 : vector<8x128xi1>, vector<8x128xf32>
    %68 = arith.truncf %67 : vector<8x128xf32> to vector<8x128xbf16>
    %c0_32 = arith.constant 0 : index
    %c0_33 = arith.constant 0 : index
    %c0_34 = arith.constant 0 : index
    %69 = vector.load %arg13[%c0_32, %c0_33, %c0_34] : memref<1x128x128xbf16, #tpu.memory_space<vmem>>, vector<1x128x128xbf16>
    %70 = vector.shape_cast %69 : vector<1x128x128xbf16> to vector<128x128xbf16>
    %cst_35 = arith.constant dense<0.000000e+00> : vector<8x128xf32>
    %71 = tpu.matmul %68, %70, %cst_35 {dimension_numbers = #tpu.dot_dimension_numbers<[1], [0], [0], [1], [0, 0, 1, 1], [], []>} : vector<8x128xbf16>, vector<128x128xbf16>, vector<8x128xf32> -> vector<8x128xf32>
    %c0_36 = arith.constant 0 : index
    %c0_37 = arith.constant 0 : index
    %c0_38 = arith.constant 0 : index
    %72 = vector.load %arg14[%c0_36, %c0_37, %c0_38] : memref<1x1x128xf32, #tpu.memory_space<vmem>>, vector<1x1x128xf32>
    %73 = vector.shape_cast %72 : vector<1x1x128xf32> to vector<1x128xf32>
    %74 = vector.broadcast %73 : vector<1x128xf32> to vector<8x128xf32>
    %75 = arith.addf %71, %74 : vector<8x128xf32>
    %76 = vector.broadcast %4 : f32 to vector<8x128xf32>
    %77 = arith.mulf %76, %8 : vector<8x128xf32>
    %78 = vector.broadcast %6 : f32 to vector<8x128xf32>
    %79 = arith.mulf %78, %75 : vector<8x128xf32>
    %80 = arith.addf %77, %79 : vector<8x128xf32>
    %c0_39 = arith.constant 0 : index
    %c0_40 = arith.constant 0 : index
    %c0_41 = arith.constant 0 : index
    %81 = vector.load %arg17[%c0_39, %c0_40, %c0_41] : memref<1x8x128xf32, #tpu.memory_space<vmem>>, vector<1x8x128xf32>
    %82 = vector.shape_cast %81 : vector<1x8x128xf32> to vector<8x128xf32>
    %83 = vector.shape_cast %80 : vector<8x128xf32> to vector<1x8x128xf32>
    tpu.vector_store %arg17[%c0_39, %c0_40, %c0_41], %83 {strides = array<i32>} : memref<1x8x128xf32, #tpu.memory_space<vmem>>, vector<1x8x128xf32>,
    %84 = arith.truncf %80 : vector<8x128xf32> to vector<8x128xbf16>
    %c0_42 = arith.constant 0 : index
    %c0_43 = arith.constant 0 : index
    %c0_44 = arith.constant 0 : index
    %85 = vector.load %arg15[%c0_42, %c0_43, %c0_44] : memref<1x128x256xbf16, #tpu.memory_space<vmem>>, vector<1x128x256xbf16>
    %86 = vector.shape_cast %85 : vector<1x128x256xbf16> to vector<128x256xbf16>
    %cst_45 = arith.constant dense<0.000000e+00> : vector<8x256xf32>
    %87 = tpu.matmul %84, %86, %cst_45 {dimension_numbers = #tpu.dot_dimension_numbers<[1], [0], [0], [1], [0, 0, 1, 1], [], []>} : vector<8x128xbf16>, vector<128x256xbf16>, vector<8x256xf32> -> vector<8x256xf32>
    %88 = vector.extract_strided_slice %87 {offsets = [0, 0], sizes = [8, 128], strides = [1, 1]} : vector<8x256xf32> to vector<8x128xf32>
    %89 = vector.extract_strided_slice %87 {offsets = [0, 128], sizes = [8, 128], strides = [1, 1]} : vector<8x256xf32> to vector<8x128xf32>
    %90 = vector.shape_cast %88 : vector<8x128xf32> to vector<8x1x128xf32>
    %91 = vector.shape_cast %90 : vector<8x1x128xf32> to vector<8x1x128xf32>
    %92 = vector.broadcast %91 : vector<8x1x128xf32> to vector<8x4x128xf32>
    %93 = vector.shape_cast %92 : vector<8x4x128xf32> to vector<32x128xf32>
    %94 = arith.truncf %89 : vector<8x128xf32> to vector<8x128xbf16>
    %cst_46 = arith.constant dense<0.000000e+00> : vector<32x128xf32>
    %95 = tpu.matmul %12, %94, %cst_46 {dimension_numbers = #tpu.dot_dimension_numbers<[1], [0], [0], [1], [0, 0, 1, 1], [], []>} : vector<32x8xbf16>, vector<8x128xbf16>, vector<32x128xf32> -> vector<32x128xf32>
    %96 = arith.addf %93, %95 : vector<32x128xf32>
    %97 = arith.addf %96, %39 : vector<32x128xf32>
    %c0_47 = arith.constant 0 : index
    %c0_48 = arith.constant 0 : index
    %c0_49 = arith.constant 0 : index
    %98 = vector.load %arg16[%c0_47, %c0_48, %c0_49] : memref<1x1x128xf32, #tpu.memory_space<vmem>>, vector<1x1x128xf32>
    %99 = vector.shape_cast %98 : vector<1x1x128xf32> to vector<1x128xf32>
    %100 = vector.broadcast %99 : vector<1x128xf32> to vector<32x128xf32>
    %101 = arith.addf %97, %100 : vector<32x128xf32>
    %cst_50 = arith.constant 0.000000e+00 : f32
    %102 = vector.broadcast %cst_50 : f32 to vector<32x128xf32>
    %103 = arith.maximumf %101, %102 : vector<32x128xf32>
    %104 = vector.broadcast %cst_50 : f32 to vector<32x128xf32>
    %105 = arith.subf %101, %104 : vector<32x128xf32>
    %106 = arith.cmpf one, %105, %105 : vector<32x128xf32>
    %107 = vector.broadcast %cst_50 : f32 to vector<32x128xf32>
    %108 = arith.addf %101, %107 : vector<32x128xf32>
    %109 = math.absf %105 : vector<32x128xf32>
    %cst_51 = arith.constant 0.000000e+00 : f32
    %110 = vector.broadcast %cst_51 : f32 to vector<32x128xf32>
    %111 = arith.subf %110, %109 : vector<32x128xf32>
    %112 = math.exp %111 : vector<32x128xf32>
    %113 = math.log1p %112 : vector<32x128xf32>
    %114 = arith.addf %103, %113 : vector<32x128xf32>
    %115 = arith.select %106, %108, %114 : vector<32x128xi1>, vector<32x128xf32>
    %116 = vector.broadcast %14 : vector<32x1xf32> to vector<32x128xf32>
    %117 = arith.mulf %116, %115 : vector<32x128xf32>
    %118 = arith.addf %10, %117 : vector<32x128xf32>
    %c0_52 = arith.constant 0 : index
    %c0_53 = arith.constant 0 : index
    %c0_54 = arith.constant 0 : index
    %119 = vector.load %arg18[%c0_52, %c0_53, %c0_54] : memref<1x32x128xf32, #tpu.memory_space<vmem>>, vector<1x32x128xf32>
    %120 = vector.shape_cast %119 : vector<1x32x128xf32> to vector<32x128xf32>
    %121 = vector.shape_cast %118 : vector<32x128xf32> to vector<1x32x128xf32>
    tpu.vector_store %arg18[%c0_52, %c0_53, %c0_54], %121 {strides = array<i32>} : memref<1x32x128xf32, #tpu.memory_space<vmem>>, vector<1x32x128xf32>,
    return
  }
  func.func @transform_0(%arg0: i32, %arg1: i32) -> (i32, i32) {
    %c0_i32 = arith.constant 0 : i32
    %c0_i32_0 = arith.constant 0 : i32
    %c0_i32_1 = arith.constant 0 : i32
    return %c0_i32, %c0_i32_0 : i32, i32
  }
  func.func @transform_1(%arg0: i32, %arg1: i32) -> (i32, i32) {
    %c0_i32 = arith.constant 0 : i32
    %c0_i32_0 = arith.constant 0 : i32
    %c0_i32_1 = arith.constant 0 : i32
    return %c0_i32, %c0_i32_0 : i32, i32
  }
  func.func @transform_2(%arg0: i32, %arg1: i32) -> (i32, i32, i32) {
    %c0_i32 = arith.constant 0 : i32
    %c0_i32_0 = arith.constant 0 : i32
    %c0_i32_1 = arith.constant 0 : i32
    return %arg0, %c0_i32, %c0_i32_0 : i32, i32, i32
  }
  func.func @transform_3(%arg0: i32, %arg1: i32) -> (i32, i32, i32) {
    %c0_i32 = arith.constant 0 : i32
    %c0_i32_0 = arith.constant 0 : i32
    %c0_i32_1 = arith.constant 0 : i32
    return %arg0, %c0_i32, %c0_i32_0 : i32, i32, i32
  }
  func.func @transform_4(%arg0: i32, %arg1: i32) -> (i32, i32) {
    %c0_i32 = arith.constant 0 : i32
    %c0_i32_0 = arith.constant 0 : i32
    %c0_i32_1 = arith.constant 0 : i32
    return %c0_i32, %c0_i32_0 : i32, i32
  }
  func.func @transform_5(%arg0: i32, %arg1: i32) -> (i32, i32, i32) {
    %c0_i32 = arith.constant 0 : i32
    %c0_i32_0 = arith.constant 0 : i32
    %c0_i32_1 = arith.constant 0 : i32
    return %arg0, %c0_i32, %c0_i32_0 : i32, i32, i32
  }
  func.func @transform_6(%arg0: i32, %arg1: i32) -> (i32, i32, i32) {
    %c0_i32 = arith.constant 0 : i32
    %c0_i32_0 = arith.constant 0 : i32
    %c0_i32_1 = arith.constant 0 : i32
    return %arg0, %c0_i32, %c0_i32_0 : i32, i32, i32
  }
  func.func @transform_7(%arg0: i32, %arg1: i32) -> (i32, i32, i32) {
    %c0_i32 = arith.constant 0 : i32
    %c0_i32_0 = arith.constant 0 : i32
    %c0_i32_1 = arith.constant 0 : i32
    return %arg1, %c0_i32, %c0_i32_0 : i32, i32, i32
  }
  func.func @transform_8(%arg0: i32, %arg1: i32) -> (i32, i32, i32) {
    %c0_i32 = arith.constant 0 : i32
    %c0_i32_0 = arith.constant 0 : i32
    %c0_i32_1 = arith.constant 0 : i32
    return %arg1, %c0_i32, %c0_i32_0 : i32, i32, i32
  }
  func.func @transform_9(%arg0: i32, %arg1: i32) -> (i32, i32, i32) {
    %c0_i32 = arith.constant 0 : i32
    %c0_i32_0 = arith.constant 0 : i32
    %c0_i32_1 = arith.constant 0 : i32
    return %arg1, %c0_i32, %c0_i32_0 : i32, i32, i32
  }
  func.func @transform_10(%arg0: i32, %arg1: i32) -> (i32, i32, i32) {
    %c0_i32 = arith.constant 0 : i32
    %c0_i32_0 = arith.constant 0 : i32
    %c0_i32_1 = arith.constant 0 : i32
    return %arg1, %c0_i32, %c0_i32_0 : i32, i32, i32
  }
  func.func @transform_11(%arg0: i32, %arg1: i32) -> (i32, i32, i32) {
    %c0_i32 = arith.constant 0 : i32
    %c0_i32_0 = arith.constant 0 : i32
    %c0_i32_1 = arith.constant 0 : i32
    return %arg1, %c0_i32, %c0_i32_0 : i32, i32, i32
  }
  func.func @transform_12(%arg0: i32, %arg1: i32) -> (i32, i32, i32) {
    %c0_i32 = arith.constant 0 : i32
    %c0_i32_0 = arith.constant 0 : i32
    %c0_i32_1 = arith.constant 0 : i32
    return %arg1, %c0_i32, %c0_i32_0 : i32, i32, i32
  }
  func.func @transform_13(%arg0: i32, %arg1: i32) -> (i32, i32, i32) {
    %c0_i32 = arith.constant 0 : i32
    %c0_i32_0 = arith.constant 0 : i32
    %c0_i32_1 = arith.constant 0 : i32
    return %arg1, %c0_i32, %c0_i32_0 : i32, i32, i32
  }
  func.func @transform_14(%arg0: i32, %arg1: i32) -> (i32, i32, i32) {
    %c0_i32 = arith.constant 0 : i32
    %c0_i32_0 = arith.constant 0 : i32
    %c0_i32_1 = arith.constant 0 : i32
    return %arg1, %c0_i32, %c0_i32_0 : i32, i32, i32
  }
  func.func @transform_15(%arg0: i32, %arg1: i32) -> (i32, i32, i32) {
    %c0_i32 = arith.constant 0 : i32
    %c0_i32_0 = arith.constant 0 : i32
    %c0_i32_1 = arith.constant 0 : i32
    return %arg0, %c0_i32, %c0_i32_0 : i32, i32, i32
  }
  func.func @transform_16(%arg0: i32, %arg1: i32) -> (i32, i32, i32) {
    %c0_i32 = arith.constant 0 : i32
    %c0_i32_0 = arith.constant 0 : i32
    %c0_i32_1 = arith.constant 0 : i32
    return %arg0, %c0_i32, %c0_i32_0 : i32, i32, i32
  }
}

</mosaic_0001>

<bundles_post_ra>
// kernel: eq.8
= control target key start
LH: loop header
LB: loop body
LE: loop exit
PB: predicated region body
PF: predicated region fallthrough
CT: control target
= control target key end

     0   :  { %s7_s6 = smov 3  ;;  %s21_s9 = smov 3  ;;  %vm4_vm0 = vcmask 31744   ;;  %vm11_vm1 = vcmask 261344   ;;  %vm18_vm2 = vcmask 228544   ;;  %vm25_vm3 = vcmask 195744   ;;  %s119_s0 = inlined_call_operand.vmem [shape: s32[2,8,4], index: 0, kind: input, shape index: {}]   ;;  %s120_s1 = inlined_call_operand.vmem [shape: s32[2,32], index: 1, kind: output, shape index: {}]  }
   0x1   :  { %v61_v0 = vld [vmem:[%s119_s0 + $0x7] ss:$8 sm:%s7_s6]   ;;  %s75_s10 = smov 28   ;;  %v63_v1 = vld [vmem:[%s119_s0 + $0x5] ss:$8 sm:%s21_s9]   ;;  %s14_s13 = smov 3 }
   0x2   :  { %9 = vrot.lane.b32.xlu0 %v61_v0, %s75_s10  ;;  %s76_s14 = smov 20   ;;  %v62_v2 = vld [vmem:[%s119_s0 + $0x6] ss:$8 sm:%s14_s13]   ;;  %s28_s17 = smov 3  ;;  %vm32_vm4 = vcmask 162944   ;;  %vm39_vm5 = vcmask 130144  }
   0x3   :  { %23 = vrot.lane.b32.xlu1 %v63_v1, %s76_s14  ;;  %v64_v3 = vld [vmem:[%s119_s0 + $0x4] ss:$8 sm:%s28_s17]   ;;  %s35_s20 = smov 3  ;;  %s42_s21 = smov 3  ;;  %vm46_vm6 = vcmask 97344   ;;  %vm53_vm7 = vcmask 64544  }
   0x4   :  { %s77_s22 = smov 24   ;;  %s78_s23 = smov 16   ;;  %v65_v4 = vld [vmem:[%s119_s0 + $0x3] ss:$8 sm:%s35_s20]   ;;  %v66_v5 = vld [vmem:[%s119_s0 + $0x2] ss:$8 sm:%s42_s21]  }
   0x5   :  { %s2_s26 = smov 3  ;;  %s49_s29 = smov 3 }
   0x6   :  { %16 = vrot.lane.b32.xlu0 %v62_v2, %s77_s22  ;;  %v3_v6 = vld [vmem:[%s119_s0] ss:$8 sm:%s2_s26]   ;;  %s79_s3 = smov 12   ;;  %s80_s4 = smov 8  }
   0x7   :  { %30 = vrot.lane.b32.xlu1 %v64_v3, %s78_s23  ;;  %5 = vst.msk [vmem:[#allocation0] sm:$0x3] %vm4_vm0, %v3_v6   ;;  %v67_v7 = vld [vmem:[%s119_s0 + $0x1] ss:$8 sm:%s49_s29]   ;;  %s81_s0 = smov 4  }
   0xa   :  { %37 = vrot.lane.b32.xlu0 %v65_v4, %s79_s3 }
   0xb   :  { %44 = vrot.lane.b32.xlu1 %v66_v5, %s80_s4 }
   0xe   :  { %51 = vrot.lane.b32.xlu0 %v67_v7, %s81_s0 }
  0x74   :  { %v10_v8 = vpop.permute.xlu0 %9  }
  0x75   :  { %12 = vst.msk [vmem:[#allocation0] sm:$0x3] %vm11_vm1, %v10_v8   ;;  %v24_v9 = vpop.permute.xlu1 %23  }
  0x78   :  { %v17_v10 = vpop.permute.xlu0 %16  }
  0x79   :  { %19 = vst.msk [vmem:[#allocation0] sm:$0x3] %vm18_vm2, %v17_v10   ;;  %v31_v11 = vpop.permute.xlu1 %30  }
  0x7a   :  { %26 = vst.msk [vmem:[#allocation0] sm:$0x3] %vm25_vm3, %v24_v9  }
  0x7b   :  { %33 = vst.msk [vmem:[#allocation0] sm:$0x3] %vm32_vm4, %v31_v11  }
  0x7c   :  { %v38_v12 = vpop.permute.xlu0 %37  }
  0x7d   :  { %40 = vst.msk [vmem:[#allocation0] sm:$0x3] %vm39_vm5, %v38_v12   ;;  %v45_v13 = vpop.permute.xlu1 %44  }
  0x7e   :  { %47 = vst.msk [vmem:[#allocation0] sm:$0x3] %vm46_vm6, %v45_v13  }
  0x80   :  { %v52_v14 = vpop.permute.xlu0 %51  }
  0x81   :  { %54 = vst.msk [vmem:[#allocation0] sm:$0x3] %vm53_vm7, %v52_v14  }
  0x88   :  { %v58_v15 = vld [vmem:[#allocation0] sm:$0x3] }
  0x89   :  { %60 = vst [vmem:[%s120_s1] sm:$0x3] %v58_v15 }

// kernel: graph_to_features.1
= control target key start
LH: loop header
LB: loop body
LE: loop exit
PB: predicated region body
PF: predicated region fallthrough
CT: control target
= control target key end

     0   :  { %s3891_s0 = inlined_call_operand.vmem [shape: f32[3,2], index: 0, kind: input, shape index: {}]   ;;  %s3892_s1 = inlined_call_operand.<no memory space> [shape: f32[1,1], index: 1, kind: input, shape index: {}]   ;;  %s3893_s2 = inlined_call_operand.vmem [shape: f32[2,8,128], index: 2, kind: input, shape index: {}]   ;;  %s3894_s3 = inlined_call_operand.vmem [shape: f32[2,32,1], index: 3, kind: input, shape index: {}]   ;;  %s3895_s4 = inlined_call_operand.vmem [shape: f32[1,128], index: 4, kind: input, shape index: {}]   ;;  %s3896_s5 = inlined_call_operand.vmem [shape: bf16[2,32,8], index: 5, kind: input, shape index: {}]   ;;  %s3897_s6 = inlined_call_operand.vmem [shape: f32[2,32,1], index: 6, kind: input, shape index: {}]   ;;  %s3898_s7 = inlined_call_operand.vmem [shape: bf16[3,128,256], index: 7, kind: input, shape index: {}]   ;;  %s3899_s8 = inlined_call_operand.vmem [shape: f32[3,1,128], index: 8, kind: input, shape index: {}]   ;;  %s3900_s9 = inlined_call_operand.vmem [shape: bf16[3,128,128], index: 9, kind: input, shape index: {}]   ;;  %s3901_s10 = inlined_call_operand.vmem [shape: f32[3,1,128], index: 10, kind: input, shape index: {}]   ;;  %s3902_s11 = inlined_call_operand.vmem [shape: bf16[3,128,128], index: 11, kind: input, shape index: {}]   ;;  %s3903_s12 = inlined_call_operand.vmem [shape: f32[3,1,128], index: 12, kind: input, shape index: {}]   ;;  %s3904_s13 = inlined_call_operand.vmem [shape: bf16[3,128,256], index: 13, kind: input, shape index: {}]   ;;  %s3905_s14 = inlined_call_operand.vmem [shape: f32[3,1,128], index: 14, kind: input, shape index: {}]   ;;  %s3906_s15 = inlined_call_operand.hbm [shape: f32[2,8,128], index: 15, kind: output, shape index: {0}]   ;;  %s3907_s16 = inlined_call_operand.hbm [shape: f32[2,32,128], index: 16, kind: output, shape index: {1}]  }
   0x1   :  { %3926 = sst [smem:[#allocation26_spill]] %s3891_s0 }
   0x2   :  { %3927 = sst [smem:[#allocation27_spill]] %s3893_s2 }
   0x3   :  { %3928 = sst [smem:[#allocation28_spill]] %s3894_s3 }
   0x4   :  { %3929 = sst [smem:[#allocation29_spill]] %s3895_s4 }
   0x5   :  { %3930 = sst [smem:[#allocation30_spill]] %s3896_s5 }
   0x6   :  { %3931 = sst [smem:[#allocation31_spill]] %s3897_s6 }
   0x7   :  { %3932 = sst [smem:[#allocation32_spill]] %s3898_s7 }
   0x8   :  { %3933 = sst [smem:[#allocation33_spill]] %s3899_s8 }
   0x9   :  { %3934 = sst [smem:[#allocation34_spill]] %s3900_s9 }
   0xa   :  { %3935 = sst [smem:[#allocation35_spill]] %s3905_s14 }
   0xb   :  { %3936 = sst [smem:[#allocation36_spill]] %s3906_s15 }
   0xc   :  { %3937 = sst [smem:[#allocation37_spill]] %s3907_s16 }
   0xd   :  { %22 = sst [smem:[#allocation2]] %s3892_s1 }
   0xe   :  { %23 = vsyncpa [#allocation5], 0 }
   0xf   :  { %24 = vsyncpa [#allocation4], 0 }
  0x10   :  { %26 = vsyncpa [#allocation4 + $0x1], 0 }
  0x11   :  { %27 = vsyncpa [#allocation8], 0 }
  0x12   :  { %29 = vsyncpa [#allocation8 + $0x1], 0  ;;  %s3104_s23 = smov 0   ;;  %s3106_s24 = smov 0  }
  0x13   :  { %s3108_s25 = smov 0   ;;  %s3110_s26 = smov 0  }
  0x14   :  { %s3112_s27 = smov 0   ;;  %s3114_s28 = smov 0  }
  0x15   :  { %s3116_s29 = smov 0   ;;  %s3118_s1 = smov 0  }
  0x16 LB: > { %3938 = sst [smem:[#allocation12_spill]] %s2976_s23  ;;  %s2425_s30 = sadd.s32 4294967295, %s3004_s1   ;;  %s3004_s1 = sphi %s3118_s1, %s35_s1   ;;  %s3000_s29 = sphi %s3116_s29, %s4016_s29   ;;  %s2996_s28 = sphi %s3114_s28, %s4015_s28   ;;  %s2992_s27 = sphi %s3112_s27, %s4014_s27   ;;  %s2988_s26 = sphi %s3110_s26, %s4013_s26   ;;  %s2984_s25 = sphi %s3108_s25, %s4012_s25   ;;  %s2980_s24 = sphi %s3106_s24, %s4011_s24   ;;  %s2976_s23 = sphi %s3104_s23, %s4010_s23  }
  0x17   : > { %3939 = sst [smem:[#allocation13_spill]] %s2980_s24  ;;  %s2426_s0 = sadd.s32 4294967294, %s3004_s1  }
  0x18   : > { %3940 = sst [smem:[#allocation14_spill]] %s2984_s25  ;;  %s44_s17 = sadd.s32 1, %s2996_s28 }
  0x19   : > { %3941 = sst [smem:[#allocation15_spill]] %s2992_s27  ;;  %s47_s18 = sadd.s32 1, %s3000_s29 }
  0x1a   : > { %3942 = sst [smem:[#allocation16_spill]] %s2996_s28  ;;  %p45_p0 = scmp.ge.s32.totalorder %s44_s17, 3 }
  0x1b   : > { %3943 = sst [smem:[#allocation17_spill]] %s3000_s29  ;;  %s429_s19 = sadd.s32 1, %s2984_s25 }
  0x1c   : > { %3944 = sst [smem:[#allocation18_spill]] %s3004_s1  ;;  %p439_p1 = scmp.ne.s32.totalorder %s2984_s25, %s2980_s24 }
  0x1d   : > { %p440_p2 = scmp.eq.s32.totalorder %s2425_s30, 5  ;;  %s4018_s17 = smov (%p45_p0, %s44_s17), 0 }
  0x1e   : > { %3945 = sst [smem:[#allocation19_spill]] %s4018_s17  ;;  %s4020_s18 = smov (!%p45_p0, %s47_s18), %s3000_s29 }
  0x1f   : > { %p3154_p3 = por %p440_p2, %p439_p1  ;;  %p445_p4 = scmp.ne.s32.totalorder %s2980_s24, %s2976_s23 }
  0x20   : > { %p49_p5 = scmp.ge.s32.totalorder %s4020_s18, 2  ;;  %p446_p6 = scmp.eq.s32.totalorder %s2426_s0, 5 }
  0x21   : > { %s3946_s20 = scalar_select %p3154_p3, 1, 0 }
  0x22   : > { %p2427_p7 = scmp.ge.s32.totalorder %s3004_s1, 1  ;;  %p479_p8 = scmp.lt.s32.totalorder %s3004_s1, 7 }
  0x23   : > { %3947 = sst [smem:[#allocation20_spill]] %s3946_s20  ;;  %s4022_s18 = smov (%p49_p5, %s4020_s18), 0 }
  0x24   : > { %3948 = sst [smem:[#allocation21_spill]] %s4022_s18  ;;  %p3164_p9 = por %p446_p6, %p445_p4 }
  0x25   : > { %p3168_p10 = pnand %p2427_p7, %p479_p8  ;;  %s426_s17 = ssub.s32 %s3000_s29, %s4022_s18 }
  0x26   : > { %s3949_s21 = scalar_select %p3164_p9, 1, 0 }
  0x27   : > { %p427_p11 = scmp.eq.s32.totalorder %s426_s17, 0  ;;  %p2611_p12 = pneg %p3168_p10 }
  0x28   : > { %3950 = sst [smem:[#allocation22_spill]] %s3949_s21  ;;  %p3176_p13 = scmp.eq.s32.totalorder %s2425_s30, 0 }
  0x29   : > { %s3953_s1 = sld [smem:[#allocation26_spill]] }
  0x2a   : > { %s3184_s15 = scalar_select %p427_p11, %s2984_s25, %s429_s19  }
  0x2b   : > { %p2612_p0 = pnand %p3176_p13, %p2611_p12 }
  0x2c   : > { %3954 = sst [smem:[#allocation23_spill]] %s3184_s15 }
  0x2d   : > { %p2861_p2 = pneg %p2612_p0 }
  0x2f   : > { %s492_s16 = sshll.u32 %s3953_s1, 4  ;;  %s493_s16 = int_to_ptr.vmem [resolvable:$true] %s492_s16 }
  0x30   : > { %s2859_s21 = scalar_lea.vmem %s493_s16, 64  ;;  %p2867_p6 = scmp.lt.s32.totalorder %s493_s16, %s493_s16 }
  0x31   : > { %p2860_p1 = scmp.ne.s32.totalorder %s493_s16, %s2859_s21  ;;  %p2868_p7 = scmp.lt.s32.totalorder %s2859_s21, %s2859_s21 }
  0x33   : > { %p2862_p4 = pnand %p2861_p2, %p2860_p1  ;;  %p2869_p8 = por %p2868_p7, %p2867_p6 }
  0x35   : > { %p2863_p5 = pneg %p2862_p4 }
  0x37   : > { %p2870_p9 = pnand %p2869_p8, %p2863_p5 }
  0x39   : > { %2873 = shalt.err (!%p2870_p9)
}
  0x3a   : > { %s3006_s30 = smov [#allocation3]   ;;  %598 = sbr.rel (%p3168_p10) target bundleno = 1506 (0x5e2), region = 80 }
  0x3b   : > { %2614 = dma.vmem_to_smem (!%p2612_p0), %s493_s16, 64, %s3006_s30, [#allocation5]  }
  0x41   : > { %2963 = dma.done.wait (%p3176_p13), [#allocation5], 64  }
  0x42   : > { %2965 = vsyncadd (%p3176_p13), [#allocation5], 4294967232 }
  0x43   : > { %604 = sfence }
  0x44   : > { %s3195_s23 = sand.u32 1, %s2980_s24   ;;  %p700_p9 = scmp.lt.s32.totalorder %s2992_s27, 1 }
  0x45   : > { %3955 = sst [smem:[#allocation24_spill]] %s3195_s23  ;;  %s2432_s16 = sshll.u32 %s3195_s23, 3 }
  0x46   : > { %s2433_s28 = sshll.u32 %s3195_s23, 5  ;;  %p719_p10 = scmp.lt.s32.totalorder %s2988_s26, 2 }
  0x47   : > { %s701_s1 = scalar_select %p700_p9, %s2992_s27, 1 }
  0x48   : > { %s3956_s2 = sld [smem:[#allocation27_spill]]  ;;  %s3957_s3 = sld [smem:[#allocation28_spill]] }
  0x49   : > { %s2434_s17 = sshll.u32 %s701_s1, 3  ;;  %s2517_s19 = sshll.u32 %s701_s1, 5 }
  0x4a   : > { %s2518_s15 = sshll.u32 %s701_s1, 4  ;;  %s3958_s6 = sld [smem:[#allocation31_spill]] }
  0x4b   : > { %s3960_s5 = sld [smem:[#allocation30_spill]]  ;;  %s3962_s7 = sld [smem:[#allocation32_spill]] }
  0x4c   : > { %s3221_s14 = scalar_select %p719_p10, %s2988_s26, 2 }
  0x4d   : > { %s3963_s9 = sld [smem:[#allocation34_spill]]  ;;  %s3263_s30 = scalar_lea.vmem [#allocation7], %s2433_s28 }
  0x4e   : > { %s3205_s0 = scalar_lea.vmem %s3956_s2, %s2434_s17  ;;  %s708_s29 = scalar_lea.vmem %s3957_s3, %s2517_s19 }
  0x4f   : > { %s2520_s18 = sshll.u32 %s3221_s14, 7  ;;  %s734_s3 = scalar_lea.vmem %s3901_s10, %s3221_s14 }
  0x50   : > { %s3213_s20 = scalar_lea.vmem %s3958_s6, %s2517_s19  ;;  %s742_s25 = scalar_lea.vmem %s3903_s12, %s3221_s14 }
  0x51   : > { %3959 = sst [smem:[#allocation25_spill]] %s3213_s20  ;;  %s3218_s4 = scalar_lea.vmem %s3960_s5, %s2518_s15 }
  0x52   : > { %s3231_s21 = scalar_lea.vmem %s3962_s7, %s2520_s18  ;;  %s2521_s15 = sshll.u32 %s3221_s14, 6 }
  0x53   : > { %s3237_s22 = scalar_lea.vmem %s3963_s9, %s2521_s15  ;;  %s3246_s1 = scalar_lea.vmem %s3902_s11, %s2521_s15 }
  0x54   : > { %s3255_s8 = scalar_lea.vmem %s3904_s13, %s2520_s18  ;;  %s3964_s9 = sld [smem:[#allocation35_spill]] }
  0x55   : > { %s3261_s2 = scalar_lea.vmem [#allocation6], %s2432_s16  ;;  %p2449_p11 = scmp.ne.s32.totalorder %s2988_s26, 0 }
  0x56   : > { %v761_v0 = vld [vmem:[%s708_s29 + $0x10] sm:$0xff] (!%p2449_p11)  ;;  %v759_v1 = vld [vmem:[%s708_s29] sm:$0xff] (!%p2449_p11)  ;;  %v3007_v2 = vmov (!%p2449_p11), 0   ;;  %v762_v3 = vld [vmem:[%s708_s29 + $0x18] sm:$0xff] (!%p2449_p11)  ;;  %s758_s5 = sld [smem:[#allocation2]] (!%p2449_p11) }
  0x57   : > { %755 = sbr.rel (%p2449_p11) target bundleno = 241 (0xf1), region = 88  ;;  %2698 = vset.pattern.permute.xlu1 (!%p2449_p11), %v3007_v2  ;;  %2697 = vset.pattern.permute.xlu0 (!%p2449_p11), %v3007_v2  ;;  %v760_v4 = vld [vmem:[%s708_s29 + $0x8] sm:$0xff] (!%p2449_p11)  ;;  %v756_v5 = vld [vmem:[%s3205_s0] sm:$0xff] (!%p2449_p11) }
  0x58   : > { %776 = vperm.xlu1 (!%p2449_p11), %2698, %v761_v0   ;;  %766 = vperm.xlu0 (!%p2449_p11), %2697, %v759_v1   ;;  %757 = vst [vmem:[%s3261_s2] sm:$0xff] (!%p2449_p11), %v756_v5 }
  0x5a   : > { %s750_s20 = scalar_lea.vmem %s3964_s9, %s3221_s14  ;;  %s3965_s9 = sld [smem:[#allocation29_spill]] (!%p2449_p11) }
  0x5c   : > { %781 = vperm.xlu1 (!%p2449_p11), %2698, %v762_v3   ;;  %771 = vperm.xlu0 (!%p2449_p11), %2697, %v760_v4   ;;  %v794_v8 = vstv (!%p2449_p11), %s758_s5 }
  0x60   : > { %v2450_v6 = vld [vmem:[%s3965_s9] ss:$0 sm:$0xff] }
  0xd7   : > { %v777_v7 = vpop.permute.xlu1 %776  ;;  %v767_v9 = vpop.permute.xlu0 %766 }
  0xd8   : > { %v792_v10 = vsub.f32 %v777_v7, %v2450_v6  ;;  %v790_v11 = vsub.f32 %v767_v9, %v2450_v6 }
  0xda   : > { %v797_v12 = vmul.f32 %v794_v8, %v792_v10  ;;  %v795_v13 = vmul.f32 %v794_v8, %v790_v11 }
  0xdb   : > { %v782_v14 = vpop.permute.xlu1 %781  ;;  %v772_v15 = vpop.permute.xlu0 %771 }
  0xdc   : > { %v801_v16 = vmul.f32 %v797_v12, %v792_v10  ;;  %v799_v17 = vmul.f32 %v795_v13, %v790_v11  ;;  %v793_v18 = vsub.f32 %v782_v14, %v2450_v6  ;;  %v791_v19 = vsub.f32 %v772_v15, %v2450_v6 }
  0xde   : > { %v807_v20 = vmul.f32 1.442695, %v801_v16  ;;  %v803_v21 = vmul.f32 1.442695, %v799_v17  ;;  %v798_v22 = vmul.f32 %v794_v8, %v793_v18  ;;  %v796_v23 = vmul.f32 %v794_v8, %v791_v19 }
  0xe0   : > { %2699 = vpow2.f32 %v807_v20  ;;  %v802_v24 = vmul.f32 %v798_v22, %v793_v18  ;;  %v800_v25 = vmul.f32 %v796_v23, %v791_v19 }
  0xe1   : > { %2701 = vpow2.f32 %v803_v21 }
  0xe2   : > { %v809_v26 = vmul.f32 1.442695, %v802_v24  ;;  %v805_v27 = vmul.f32 1.442695, %v800_v25 }
  0xe4   : > { %2703 = vpow2.f32 %v809_v26 }
  0xe5   : > { %2705 = vpow2.f32 %v805_v27 }
  0xea   : > { %v2700_v28 = vpop.eup %2699 }
  0xeb   : > { %v2702_v29 = vpop.eup %2701  ;;  %813 = vst [vmem:[%s3263_s30 + $0x10] sm:$0xff] %v2700_v28 }
  0xec   : > { %811 = vst [vmem:[%s3263_s30] sm:$0xff] %v2702_v29 }
  0xee   : > { %v2704_v30 = vpop.eup %2703 }
  0xef   : > { %v2706_v31 = vpop.eup %2705  ;;  %814 = vst [vmem:[%s3263_s30 + $0x18] sm:$0xff] %v2704_v30 }
  0xf0   : > { %812 = vst [vmem:[%s3263_s30 + $0x8] sm:$0xff] %v2706_v31 }
  0xf1 PF: > { %v2709_v32 = vld [vmem:[%s3237_s22] sm:$0xff]   ;;  %v3008_v33 = vmov 0.0   ;;  %v2710_v34 = vld [vmem:[%s3237_s22 + $0x8] sm:$0xff]   ;;  %vm3009_vm0 = vmmov 0   ;;  %v3010_v35 = vmov 0   ;;  %v2711_v36 = vld [vmem:[%s3237_s22 + $0x10] sm:$0xff]  }
  0xf2   : > { %2549 = vmatprep.subr.bf16.mxu1 %v3008_v33  ;;  %2565 = vmatprep.mubr.msk.bf16.mxu1 %vm3009_vm0, %v3008_v33  ;;  %v2717_v37 = vld [vmem:[%s3231_s21 + $0x4] ss:$8 sps:$4 sm:$0xff]   ;;  %v2719_v38 = vld [vmem:[%s3231_s21] ss:$8 sps:$4 sm:$0xff]   ;;  %v2712_v39 = vld [vmem:[%s3237_s22 + $0x18] sm:$0xff]   ;;  %s3966_s29 = sld [smem:[#allocation25_spill]] }
  0xf3   : > { %2550 = vmatpush3.bf16.msra.mxu1 %v2709_v32  ;;  %963 = vmatprep.mubr.bf16.mxu0 %v3010_v35  ;;  %v2720_v40 = vld [vmem:[%s3231_s21 + $0x14] ss:$8 sps:$4 sm:$0xff]   ;;  %v2722_v41 = vld [vmem:[%s3231_s21 + $0x10] ss:$8 sps:$4 sm:$0xff]   ;;  %v2723_v42 = vld [vmem:[%s3231_s21 + $0x24] ss:$8 sps:$4 sm:$0xff]  }
  0xf4   : > { %2551 = vmatprep.subr.bf16.mxu1 %v3008_v33  ;;  %2707 = vset.pattern.permute.xlu0 %v3010_v35  ;;  %v2713_v43 = vld [vmem:[%s3237_s22 + $0x20] sm:$0xff]   ;;  %v2726_v45 = vld [vmem:[%s3231_s21 + $0x34] ss:$8 sps:$4 sm:$0xff]   ;;  %v2714_v46 = vld [vmem:[%s3237_s22 + $0x28] sm:$0xff]   ;;  %vm1189_vm1 = vcmask 64512   ;;  %vm1196_vm2 = vcmask 1043456  }
  0xf5   : > { %2708 = vset.pattern.permute.xlu1 %v3010_v35  ;;  %931 = vmatprep.subr.bf16.mxu0 %v2717_v37  ;;  %v2725_v44 = vld [vmem:[%s3231_s21 + $0x20] ss:$8 sps:$4 sm:$0xff]   ;;  %v2728_v47 = vld [vmem:[%s3231_s21 + $0x30] ss:$8 sps:$4 sm:$0xff]   ;;  %v2729_v49 = vld [vmem:[%s3231_s21 + $0x44] ss:$8 sps:$4 sm:$0xff]  }
  0xf6   : > { %932 = vmatpush1.bf16.msra.mxu0 %v2719_v38  ;;  %v2715_v48 = vld [vmem:[%s3237_s22 + $0x30] sm:$0xff]   ;;  %v2731_v50 = vld [vmem:[%s3231_s21 + $0x40] ss:$8 sps:$4 sm:$0xff]   ;;  %v2716_v52 = vld [vmem:[%s3237_s22 + $0x38] sm:$0xff]   ;;  %s3967_s28 = sld [smem:[#allocation33_spill]]  ;;  %s3990_s5 = sld [smem:[#allocation36_spill]] }
  0xf7   : > { %2552 = vmatpush3.bf16.msra.mxu1 %v2710_v34  ;;  %933 = vmatprep.subr.bf16.mxu0 %v2720_v40  ;;  %v2732_v51 = vld [vmem:[%s3231_s21 + $0x54] ss:$8 sps:$4 sm:$0xff]   ;;  %v3307_v53 = vld [vmem:[%s3261_s2] sm:$0xff]  ;;  %v2734_v54 = vld [vmem:[%s3231_s21 + $0x50] ss:$8 sps:$4 sm:$0xff]   ;;  %s2175_s7 = sshll.u32 %s3261_s2, 4  ;;  %s2176_s7 = int_to_ptr.vmem [resolvable:$true] %s2175_s7 }
  0xf8   : > { %2553 = vmatprep.subr.bf16.mxu1 %v3008_v33  ;;  %v2735_v55 = vld [vmem:[%s3231_s21 + $0x64] ss:$8 sps:$4 sm:$0xff]   ;;  %v832_v56 = vpack.c.bf16 %v3307_v53, %v3307_v53  ;;  %v2737_v57 = vld [vmem:[%s3231_s21 + $0x60] ss:$8 sps:$4 sm:$0xff]   ;;  %v2738_v58 = vld [vmem:[%s3231_s21 + $0x74] ss:$8 sps:$4 sm:$0xff]  }
  0xf9   : > { %v2740_v59 = vld [vmem:[%s3231_s21 + $0x70] ss:$8 sps:$4 sm:$0xff]   ;;  %v822_v63 = vld [vmem:[%s3263_s30 + $0x10] sm:$0xff]  ;;  %v823_v0 = vld [vmem:[%s3263_s30 + $0x18] sm:$0xff] }
  0xfa   : > { %934 = vmatpush1.bf16.msra.mxu0 %v2722_v41  ;;  %v820_v60 = vld [vmem:[%s3263_s30] sm:$0xff]  ;;  %v821_v61 = vld [vmem:[%s3263_s30 + $0x8] sm:$0xff]  ;;  %v834_v1 = vpack.c.bf16 %v823_v0, %v822_v63  ;;  %v3326_v2 = vld [vmem:[%s3218_s4] sm:$0xff]  }
  0xfb   : > { %2554 = vmatpush3.bf16.msra.mxu1 %v2711_v36  ;;  %935 = vmatprep.subr.bf16.mxu0 %v2723_v42  ;;  %v833_v62 = vpack.c.bf16 %v821_v61, %v820_v60  ;;  %v828_v3 = vld [vmem:[%s3966_s29] sm:$0xff]  ;;  %v830_v4 = vld [vmem:[%s3966_s29 + $0x10] sm:$0xff]  ;;  %v829_v5 = vld [vmem:[%s3966_s29 + $0x8] sm:$0xff] }
  0xfc   : > { %2555 = vmatprep.subr.bf16.mxu1 %v3008_v33  ;;  %1255 = vperm.xlu0 %2707, %v828_v3   ;;  %v831_v6 = vld [vmem:[%s3966_s29 + $0x18] sm:$0xff]  ;;  %v3337_v13 = vld [vmem:[%s3218_s4 + $0x8] sm:$0xff]   ;;  %v2743_v22 = vld [vmem:[%s3246_s1] sm:$0xff]   ;;  %s3968_s0 = scalar_lea.vmem %s3967_s28, %s3221_s14  ;;  %s2874_s29 = scalar_lea.vmem %s2176_s7, 128 }
  0xfd   : > { %1265 = vperm.xlu1 %2708, %v830_v4   ;;  %v2744_v23 = vld [vmem:[%s3246_s1 + $0x8] sm:$0xff]   ;;  %v2745_v24 = vld [vmem:[%s3246_s1 + $0x10] sm:$0xff]   ;;  %v2746_v25 = vld [vmem:[%s3246_s1 + $0x18] sm:$0xff]   ;;  %p2875_p12 = scmp.ne.s32.totalorder %s2176_s7, %s2874_s29  ;;  %s3011_s4 = smov [#allocation6]  }
  0xfe   : > { %936 = vmatpush1.bf16.msra.mxu0 %v2725_v44  ;;  %v2747_v26 = vld [vmem:[%s3246_s1 + $0x20] sm:$0xff]   ;;  %v2748_v28 = vld [vmem:[%s3246_s1 + $0x28] sm:$0xff]   ;;  %v2749_v32 = vld [vmem:[%s3246_s1 + $0x30] sm:$0xff]   ;;  %s2878_s16 = sshll.u32 %s3011_s4, 4  ;;  %s2879_s16 = int_to_ptr.vmem [resolvable:$false] %s2878_s16 }
  0xff   : > { %2556 = vmatpush3.bf16.msra.mxu1 %v2712_v39  ;;  %937 = vmatprep.subr.bf16.mxu0 %v2726_v45  ;;  %v2468_v27 = vld [vmem:[%s3968_s0] ss:$0 sm:$0xff]  ;;  %v2750_v38 = vld [vmem:[%s3246_s1 + $0x38] sm:$0xff]   ;;  %v2753_v41 = vld [vmem:[%s3255_s8 + $0x4] ss:$8 sps:$4 sm:$0xff]   ;;  %p2876_p13 = pnand %p2875_p12, %p3154_p3  ;;  %s2880_s28 = scalar_lea.vmem %s2879_s16, 256 }
 0x100   : > { %2557 = vmatprep.subr.bf16.mxu1 %v3008_v33  ;;  %1260 = vperm.xlu0 %2707, %v829_v5   ;;  %v2751_v40 = vld [vmem:[%s3255_s8] ss:$8 sps:$4 sm:$0xff]   ;;  %v2766_v60 = vld [vmem:[%s3255_s8 + $0x50] ss:$8 sps:$4 sm:$0xff]   ;;  %p2881_p1 = scmp.lt.s32.totalorder %s2176_s7, %s2879_s16  ;;  %p2882_p2 = scmp.lt.s32.totalorder %s2880_s28, %s2874_s29 }
 0x101   : > { %1270 = vperm.xlu1 %2708, %v831_v6   ;;  %p2877_p0 = pneg %p2876_p13 }
 0x102   : > { %938 = vmatpush1.bf16.msra.mxu0 %v2728_v47  ;;  %p2883_p4 = por %p2882_p2, %p2881_p1 }
 0x103   : > { %2558 = vmatpush3.bf16.msra.mxu1 %v2713_v43  ;;  %939 = vmatprep.subr.bf16.mxu0 %v2729_v49  ;;  %v2756_v43 = vld [vmem:[%s3255_s8 + $0x14] ss:$8 sps:$4 sm:$0xff]  }
 0x104   : > { %2559 = vmatprep.subr.bf16.mxu1 %v3008_v33  ;;  %p2884_p5 = pnand %p2883_p4, %p2877_p0 }
 0x106   : > { %940 = vmatpush1.bf16.msra.mxu0 %v2731_v50 }
 0x107   : > { %2560 = vmatpush3.bf16.msra.mxu1 %v2714_v46  ;;  %941 = vmatprep.subr.bf16.mxu0 %v2732_v51  ;;  %v2754_v46 = vld [vmem:[%s3255_s8 + $0x10] ss:$8 sps:$4 sm:$0xff]   ;;  %v2757_v51 = vld [vmem:[%s3255_s8 + $0x20] ss:$8 sps:$4 sm:$0xff]  }
 0x108   : > { %2561 = vmatprep.subr.bf16.mxu1 %v3008_v33 }
 0x10a   : > { %942 = vmatpush1.bf16.msra.mxu0 %v2734_v54  ;;  %v2762_v54 = vld [vmem:[%s3255_s8 + $0x34] ss:$8 sps:$4 sm:$0xff]  }
 0x10b   : > { %2562 = vmatpush3.bf16.msra.mxu1 %v2715_v48  ;;  %943 = vmatprep.subr.bf16.mxu0 %v2735_v55  ;;  %v2759_v48 = vld [vmem:[%s3255_s8 + $0x24] ss:$8 sps:$4 sm:$0xff]   ;;  %v2760_v55 = vld [vmem:[%s3255_s8 + $0x30] ss:$8 sps:$4 sm:$0xff]  }
 0x10c   : > { %2563 = vmatprep.subr.bf16.mxu1 %v3008_v33 }
 0x10e   : > { %944 = vmatpush1.bf16.msra.mxu0 %v2737_v57  ;;  %v2763_v57 = vld [vmem:[%s3255_s8 + $0x40] ss:$8 sps:$4 sm:$0xff]  }
 0x10f   : > { %2564 = vmatpush3.bf16.msra.mxu1 %v2716_v52  ;;  %945 = vmatprep.subr.bf16.mxu0 %v2738_v58  ;;  %v2768_v58 = vld [vmem:[%s3255_s8 + $0x54] ss:$8 sps:$4 sm:$0xff]  }
 0x112   : > { %2566 = vmatmul.mubr.bf16.vlgmr.msra.gmra.mrb[0].mxu1 %v832_v56  ;;  %946 = vmatpush1.bf16.msra.mxu0 %v2740_v59  ;;  %v2765_v56 = vld [vmem:[%s3255_s8 + $0x44] ss:$8 sps:$4 sm:$0xff]  }
 0x113   : > { %2575 = vmatprep.subr.bf16.mxu0 %v3008_v33  ;;  %2571 = vmatprep.mubr.msk.bf16.mxu1 %vm1189_vm1, %v3326_v2 }
 0x115   : > { %964 = vmatmul.mubr.bf16.vlgmr.msra.gmra.mrb[0].mxu0 %v833_v62 }
 0x116   : > { %973 = vmatprep.mubr.bf16.mxu0 %v3010_v35  ;;  %2576 = vmatpush3.bf16.msra.mxu0 %v2743_v22 }
 0x117   : > { %2577 = vmatprep.subr.bf16.mxu0 %v3008_v33 }
 0x11a   : > { %2578 = vmatpush3.bf16.msra.mxu0 %v2744_v23 }
 0x11b   : > { %2579 = vmatprep.subr.bf16.mxu0 %v3008_v33 }
 0x11d   : > { %974 = vmatmul.mubr.bf16.gmra.mrb[4].mxu0 %v834_v1 }
 0x11e   : > { %2591 = vmatprep.mubr.msk.bf16.mxu0 %vm3009_vm0, %v3008_v33  ;;  %2580 = vmatpush3.bf16.msra.mxu0 %v2745_v24 }
 0x11f   : > { %2581 = vmatprep.subr.bf16.mxu0 %v3008_v33 }
 0x122   : > { %2582 = vmatpush3.bf16.msra.mxu0 %v2746_v25 }
 0x123   : > { %2583 = vmatprep.subr.bf16.mxu0 %v3008_v33 }
 0x126   : > { %2584 = vmatpush3.bf16.msra.mxu0 %v2747_v26 }
 0x127   : > { %2585 = vmatprep.subr.bf16.mxu0 %v3008_v33 }
 0x12a   : > { %2586 = vmatpush3.bf16.msra.mxu0 %v2748_v28 }
 0x12b   : > { %2587 = vmatprep.subr.bf16.mxu0 %v3008_v33 }
 0x12e   : > { %2588 = vmatpush3.bf16.msra.mxu0 %v2749_v32 }
 0x12f   : > { %2589 = vmatprep.subr.bf16.mxu0 %v3008_v33 }
 0x132   : > { %2590 = vmatpush3.bf16.msra.mxu0 %v2750_v38 }
 0x1e5   : > { %v1165_v7 = vpop.f32.mrb[0].mxu1 }
 0x1e6   : > { %v1171_v8 = vpack.c.bf16 %v1165_v7, %v1165_v7  ;;  %v2567_v9 = vpop.f32.mrb[1].mxu1 }
 0x1e7   : > { %v1168_v10 = vpop.f32.mrb[2].mxu1 }
 0x1e8   : > { %v1198_v11 = vsel %vm1196_vm2, %v1171_v8, 0  ;;  %v2568_v12 = vpop.f32.mrb[3].mxu1  ;;  %2601 = vmatprep.subr.msk.bf16.mxu1 %vm1196_vm2, %v1171_v8  ;;  %v965_v14 = vpop.f32.mrb[0].mxu0 }
 0x1e9   : > { %2570 = vmatpush3.bf16.msra.mxu1 %v1198_v11  ;;  %v3342_v15 = vpop.f32.mrb[1].mxu0  ;;  %v3368_v30 = vadd.f32 %v2468_v27, %v965_v14 }
 0x1ea   : > { %v969_v16 = vpop.f32.mrb[2].mxu0  ;;  %1743 = vmatprep.subr.bf16.mxu1 %v2753_v41 }
 0x1eb   : > { %v3344_v17 = vpop.f32.mrb[3].mxu0  ;;  %v3373_v34 = vadd.f32 %v2468_v27, %v969_v16  ;;  %v1007_v36 = vand.u32 2147483647, %v3368_v30  ;;  %vm999_vm8 = vcmp.ne.f32.partialorder %v3368_v30, %v3368_v30 }
 0x1ec   : > { %2572 = vmatmul.mubr.msk.bf16.vlgmr.msra.gmra.mrb[4].mxu1 %vm1189_vm1, %v3337_v13 }
 0x1ed   : > { %1775 = vmatprep.mubr.bf16.mxu1 %v3010_v35  ;;  %v1008_v39 = vand.u32 2147483647, %v3373_v34  ;;  %v1011_v44 = vsub.f32 0.0, %v1007_v36  ;;  %1744 = vmatpush1.bf16.msra.mxu1 %v2751_v40  ;;  %vm1000_vm10 = vcmp.ne.f32.partialorder %v3373_v34, %v3373_v34 }
 0x1ee   : > { %1745 = vmatprep.subr.bf16.mxu1 %v2756_v43  ;;  %v995_v43 = vmax.f32 %v3368_v30, 0.0 }
 0x1ef   : > { %v1012_v47 = vsub.f32 0.0, %v1008_v39  ;;  %v1015_v50 = vmul.f32 1.442695, %v1011_v44 }
 0x1f0   : > { %v975_v18 = vpop.f32.mrb[4].mxu0 }
 0x1f1   : > { %v3346_v19 = vpop.f32.mrb[5].mxu0  ;;  %v3366_v29 = vadd.f32 %v2468_v27, %v975_v18  ;;  %1746 = vmatpush1.bf16.msra.mxu1 %v2754_v46  ;;  %v1017_v52 = vmul.f32 1.442695, %v1012_v47 }
 0x1f2   : > { %v979_v20 = vpop.f32.mrb[6].mxu0  ;;  %1747 = vmatprep.subr.bf16.mxu1 %v2759_v48  ;;  %v996_v48 = vmax.f32 %v3373_v34, 0.0 }
 0x1f3   : > { %v3348_v21 = vpop.f32.mrb[7].mxu0  ;;  %v3370_v31 = vadd.f32 %v2468_v27, %v979_v20  ;;  %v1009_v35 = vand.u32 2147483647, %v3366_v29  ;;  %v997_v39 = vmax.f32 %v3366_v29, 0.0  ;;  %vm1001_vm7 = vcmp.ne.f32.partialorder %v3366_v29, %v3366_v29 }
 0x1f5   : > { %v1010_v37 = vand.u32 2147483647, %v3370_v31  ;;  %v1013_v42 = vsub.f32 0.0, %v1009_v35  ;;  %1748 = vmatpush1.bf16.msra.mxu1 %v2757_v51  ;;  %v998_v46 = vmax.f32 %v3370_v31, 0.0  ;;  %v3425_v51 = vpop.permute.xlu1 %1265  ;;  %vm1002_vm9 = vcmp.ne.f32.partialorder %v3370_v31, %v3370_v31 }
 0x1f6   : > { %1749 = vmatprep.subr.bf16.mxu1 %v2762_v54 }
 0x1f7   : > { %v1014_v45 = vsub.f32 0.0, %v1010_v37  ;;  %v1019_v49 = vmul.f32 1.442695, %v1013_v42 }
 0x1f9   : > { %v1021_v33 = vmul.f32 1.442695, %v1014_v45  ;;  %2775 = vpow2.f32 %v1019_v49  ;;  %1750 = vmatpush1.bf16.msra.mxu1 %v2760_v55 }
 0x1fa   : > { %2777 = vpow2.f32 %v1015_v50  ;;  %1751 = vmatprep.subr.bf16.mxu1 %v2765_v56 }
 0x1fb   : > { %2779 = vpow2.f32 %v1021_v33  ;;  %v2477_v33 = vld [vmem:[%s734_s3] ss:$0 sm:$0xff]  ;;  %s2451_s3 = sshll.u32 %s2988_s26, 7  ;;  %s3988_s26 = sld [smem:[#allocation24_spill]] }
 0x1fc   : > { %2781 = vpow2.f32 %v1017_v52  ;;  %s817_s21 = sadd.s32 1, %s2451_s3  ;;  %s816_s15 = sld [smem:[#allocation3 + %s2451_s3]] }
 0x1fd   : > { %1752 = vmatpush1.bf16.msra.mxu1 %v2763_v57  ;;  %v3433_v57 = vpop.permute.xlu0 %1255  ;;  %s818_s22 = sld [smem:[#allocation3 + %s817_s21]] }
 0x1fe   : > { %1753 = vmatprep.subr.bf16.mxu1 %v2768_v58 }
 0x201   : > { %1754 = vmatpush1.bf16.msra.mxu1 %v2766_v60  ;;  %s2157_s9 = scalar_lea.sflag [#allocation4], %s3988_s26 }
 0x203   : > { %v2776_v59 = vpop.eup %2775 }
 0x204   : > { %v2778_v61 = vpop.eup %2777  ;;  %v1041_v0 = vadd.f32 1.0, %v2776_v59  ;;  %v1044_v5 = vmul.f32 -0.5, %v2776_v59  ;;  %v1047_v11 = vand.u32 2147483647, %v2776_v59 }
 0x205   : > { %v2780_v62 = vpop.eup %2779  ;;  %v1023_v1 = vadd.f32 1.0, %v2778_v61  ;;  %v1026_v6 = vmul.f32 -0.5, %v2778_v61  ;;  %v1029_v16 = vand.u32 2147483647, %v2778_v61 }
 0x206   : > { %v2782_v63 = vpop.eup %2781  ;;  %v1050_v3 = vadd.f32 1.0, %v2780_v62  ;;  %2783 = vlog2.f32 %v1041_v0  ;;  %v1053_v7 = vmul.f32 -0.5, %v2780_v62  ;;  %v1045_v9 = vadd.f32 1.0, %v1044_v5 }
 0x207   : > { %v1032_v4 = vadd.f32 1.0, %v2782_v63  ;;  %2785 = vlog2.f32 %v1023_v1  ;;  %v1035_v8 = vmul.f32 -0.5, %v2782_v63  ;;  %v1027_v12 = vadd.f32 1.0, %v1026_v6 }
 0x208   : > { %2787 = vlog2.f32 %v1050_v3  ;;  %v1054_v18 = vadd.f32 1.0, %v1053_v7  ;;  %v1056_v23 = vand.u32 2147483647, %v2780_v62  ;;  %v1046_v26 = vmul.f32 %v2776_v59, %v1045_v9  ;;  %v3441_v7 = vpop.permute.xlu1 %1270 }
 0x209   : > { %2789 = vlog2.f32 %v1032_v4  ;;  %v1036_v22 = vadd.f32 1.0, %v1035_v8  ;;  %v1038_v27 = vand.u32 2147483647, %v2782_v63  ;;  %vm3394_vm3 = vcmp.lt.f32.partialorder %v1047_v11, 0.0004427343 }
 0x20a   : > { %v1028_v35 = vmul.f32 %v2778_v61, %v1027_v12  ;;  %vm3398_vm4 = vcmp.lt.f32.partialorder %v1029_v16, 0.0004427343  ;;  %v1055_v38 = vmul.f32 %v2780_v62, %v1054_v18  ;;  %vm3403_vm5 = vcmp.lt.f32.partialorder %v1056_v23, 0.0004427343 }
 0x20b   : > { %v1037_v41 = vmul.f32 %v2782_v63, %v1036_v22  ;;  %vm3410_vm6 = vcmp.lt.f32.partialorder %v1038_v27, 0.0004427343 }
 0x210   : > { %v2784_v10 = vpop.eup %2783 }
 0x211   : > { %v2786_v14 = vpop.eup %2785  ;;  %v1043_v25 = vmul.f32 0.6931472, %v2784_v10 }
 0x212   : > { %v2788_v20 = vpop.eup %2787  ;;  %v1025_v32 = vmul.f32 0.6931472, %v2786_v14 }
 0x213   : > { %v2790_v24 = vpop.eup %2789  ;;  %v1052_v37 = vmul.f32 0.6931472, %v2788_v20  ;;  %v1049_v44 = vsel %vm3394_vm3, %v1046_v26, %v1043_v25 }
 0x214   : > { %v1034_v40 = vmul.f32 0.6931472, %v2790_v24  ;;  %v1031_v47 = vsel %vm3398_vm4, %v1028_v35, %v1025_v32  ;;  %v1061_v50 = vadd.f32 %v1049_v44, %v997_v39  ;;  %vm1536_vm4 = vcmask 1041409  }
 0x215   : > { %v1058_v49 = vsel %vm3403_vm5, %v1055_v38, %v1052_v37  ;;  %v1059_v54 = vadd.f32 %v1031_v47, %v995_v43 }
 0x216   : > { %v1040_v52 = vsel %vm3410_vm6, %v1037_v41, %v1034_v40  ;;  %v1062_v56 = vadd.f32 %v1058_v49, %v998_v46  ;;  %v1065_v61 = vsel %vm1001_vm7, %v3366_v29, %v1061_v50 }
 0x217   : > { %v1060_v60 = vadd.f32 %v1040_v52, %v996_v48  ;;  %v1063_v1 = vsel %vm999_vm8, %v3368_v30, %v1059_v54  ;;  %v3448_v30 = vpop.permute.xlu0 %1260 }
 0x218   : > { %v1066_v8 = vsel %vm1002_vm9, %v3370_v31, %v1062_v56  ;;  %vm1538_vm9 = vcmask 1042434  }
 0x219   : > { %v1064_v29 = vsel %vm1000_vm10, %v3373_v34, %v1060_v60  ;;  %vm1540_vm10 = vcmask 1043459  }
 0x2bf   : > { %v2573_v55 = vpop.f32.mrb[4].mxu1 }
 0x2c0   : > { %v1243_v58 = vadd.f32 %v2573_v55, %v2477_v33  ;;  %v1234_v59 = vpop.f32.mrb[5].mxu1 }
 0x2c1   : > { %v1235_v62 = vadd.f32 %v2477_v33, %v1234_v59  ;;  %v2574_v63 = vpop.f32.mrb[6].mxu1 }
 0x2c2   : > { %v1251_v0 = vmul.f32 %v1243_v58, %v1065_v61  ;;  %v1246_v3 = vadd.f32 %v2574_v63, %v2477_v33  ;;  %v1237_v4 = vpop.f32.mrb[7].mxu1 }
 0x2c3   : > { %v1249_v5 = vmul.f32 %v1235_v62, %v1063_v1  ;;  %v1238_v6 = vadd.f32 %v2477_v33, %v1237_v4 }
 0x2c4   : > { %v1275_v9 = vmul.f32 %v3425_v51, %v1251_v0  ;;  %v1252_v10 = vmul.f32 %v1246_v3, %v1066_v8 }
 0x2c5   : > { %v1273_v11 = vmul.f32 %v3433_v57, %v1249_v5  ;;  %v1250_v12 = vmul.f32 %v1238_v6, %v1064_v29 }
 0x2c6   : > { %v1283_v14 = vcombine.high %v1275_v9, %v1275_v9  ;;  %v1317_v16 = vsel %vm1196_vm2, %v1275_v9, 0.0  ;;  %v1276_v18 = vmul.f32 %v3441_v7, %v1252_v10 }
 0x2c7   : > { %v1281_v20 = vcombine.high %v1273_v11, %v1273_v11  ;;  %v1289_v22 = vsel %vm1196_vm2, %v1273_v11, 0.0  ;;  %v1318_v23 = vrot.slane %v1317_v16, 4  ;;  %v1274_v31 = vmul.f32 %v3448_v30, %v1250_v12 }
 0x2c8   : > { %v1290_v24 = vrot.slane %v1289_v22, 4  ;;  %v1324_v34 = vsel %vm1196_vm2, %v1283_v14, 0.0  ;;  %v1284_v25 = vcombine.high %v1276_v18, %v1276_v18  ;;  %v1331_v26 = vsel %vm1196_vm2, %v1276_v18, 0.0 }
 0x2c9   : > { %v1296_v27 = vsel %vm1196_vm2, %v1281_v20, 0.0  ;;  %v1319_v28 = vadd.f32 %v1318_v23, %v1317_v16  ;;  %v1325_v32 = vrot.slane %v1324_v34, 4  ;;  %v1282_v35 = vcombine.high %v1274_v31, %v1274_v31 }
 0x2ca   : > { %v1291_v36 = vadd.f32 %v1290_v24, %v1289_v22  ;;  %v1297_v37 = vrot.slane %v1296_v27, 4  ;;  %v1303_v38 = vsel %vm1196_vm2, %v1274_v31, 0.0  ;;  %v1332_v39 = vrot.slane %v1331_v26, 4 }
 0x2cb   : > { %v1320_v40 = vrot.slane %v1319_v28, 2  ;;  %v1326_v41 = vadd.f32 %v1325_v32, %v1324_v34  ;;  %v1304_v42 = vrot.slane %v1303_v38, 4  ;;  %v1310_v43 = vsel %vm1196_vm2, %v1282_v35, 0.0 }
 0x2cc   : > { %v1292_v44 = vrot.slane %v1291_v36, 2  ;;  %v1298_v45 = vadd.f32 %v1297_v37, %v1296_v27  ;;  %v1311_v46 = vrot.slane %v1310_v43, 4  ;;  %v1333_v47 = vadd.f32 %v1332_v39, %v1331_v26 }
 0x2cd   : > { %v1321_v48 = vadd.f32 %v1320_v40, %v1319_v28  ;;  %v1327_v49 = vrot.slane %v1326_v41, 2  ;;  %v1305_v50 = vadd.f32 %v1304_v42, %v1303_v38  ;;  %v1338_v33 = vsel %vm1196_vm2, %v1284_v25, 0.0 }
 0x2ce   : > { %v1293_v52 = vadd.f32 %v1292_v44, %v1291_v36  ;;  %v1299_v54 = vrot.slane %v1298_v45, 2  ;;  %v1312_v55 = vadd.f32 %v1311_v46, %v1310_v43  ;;  %v1334_v56 = vrot.slane %v1333_v47, 2 }
 0x2cf   : > { %v1322_v58 = vrot.slane %v1321_v48, 1  ;;  %v1328_v59 = vadd.f32 %v1327_v49, %v1326_v41  ;;  %v1306_v60 = vrot.slane %v1305_v50, 2  ;;  %v1339_v61 = vrot.slane %v1338_v33, 4 }
 0x2d0   : > { %v1294_v62 = vrot.slane %v1293_v52, 1  ;;  %v1300_v63 = vadd.f32 %v1299_v54, %v1298_v45  ;;  %v1313_v0 = vrot.slane %v1312_v55, 2  ;;  %v1335_v1 = vadd.f32 %v1334_v56, %v1333_v47 }
 0x2d1   : > { %v3459_v3 = vadd.f32 %v1322_v58, %v1321_v48  ;;  %v1329_v4 = vrot.slane %v1328_v59, 1  ;;  %v1307_v29 = vadd.f32 %v1306_v60, %v1305_v50  ;;  %v1340_v16 = vadd.f32 %v1339_v61, %v1338_v33 }
 0x2d2   : > { %v3461_v5 = vadd.f32 %v1294_v62, %v1293_v52  ;;  %v1301_v6 = vrot.slane %v1300_v63, 1  ;;  %v1314_v10 = vadd.f32 %v1313_v0, %v1312_v55  ;;  %v1336_v14 = vrot.slane %v1335_v1, 1 }
 0x2d3   : > { %v3463_v8 = vadd.f32 %v1329_v4, %v1328_v59  ;;  %v1373_v9 = vand.u32 2147483647, %v3459_v3  ;;  %v1308_v34 = vrot.slane %v1307_v29, 1  ;;  %v1341_v32 = vrot.slane %v1340_v16, 2 }
 0x2d4   : > { %v3466_v11 = vadd.f32 %v1301_v6, %v1300_v63  ;;  %v1369_v12 = vand.u32 2147483647, %v3461_v5  ;;  %v1315_v25 = vrot.slane %v1314_v10, 1  ;;  %v3471_v28 = vadd.f32 %v1336_v14, %v1335_v1 }
 0x2d5   : > { %v1374_v18 = vand.u32 2147483647, %v3463_v8  ;;  %v1381_v20 = vsub.f32 0.0, %v1373_v9  ;;  %v3473_v36 = vadd.f32 %v1308_v34, %v1307_v29  ;;  %v1342_v39 = vadd.f32 %v1341_v32, %v1340_v16 }
 0x2d6   : > { %v1370_v22 = vand.u32 2147483647, %v3466_v11  ;;  %v1377_v23 = vsub.f32 0.0, %v1369_v12  ;;  %v3475_v37 = vadd.f32 %v1315_v25, %v1314_v10  ;;  %v1375_v43 = vand.u32 2147483647, %v3471_v28 }
 0x2d7   : > { %v1382_v31 = vsub.f32 0.0, %v1374_v18  ;;  %v1393_v24 = vmul.f32 1.442695, %v1381_v20  ;;  %v1371_v40 = vand.u32 2147483647, %v3473_v36  ;;  %v1343_v42 = vrot.slane %v1342_v39, 1 }
 0x2d8   : > { %v1378_v26 = vsub.f32 0.0, %v1370_v22  ;;  %v1385_v27 = vmul.f32 1.442695, %v1377_v23  ;;  %v1372_v41 = vand.u32 2147483647, %v3475_v37  ;;  %v1383_v47 = vsub.f32 0.0, %v1375_v43 }
 0x2d9   : > { %2791 = vpow2.f32 %v1393_v24  ;;  %v1395_v35 = vmul.f32 1.442695, %v1382_v31  ;;  %v1379_v44 = vsub.f32 0.0, %v1371_v40  ;;  %v3480_v46 = vadd.f32 %v1343_v42, %v1342_v39 }
 0x2da   : > { %2793 = vpow2.f32 %v1385_v27  ;;  %v1387_v38 = vmul.f32 1.442695, %v1378_v26  ;;  %v1380_v45 = vsub.f32 0.0, %v1372_v41  ;;  %v1397_v33 = vmul.f32 1.442695, %v1383_v47 }
 0x2db   : > { %2795 = vpow2.f32 %v1395_v35  ;;  %v1389_v48 = vmul.f32 1.442695, %v1379_v44  ;;  %v1376_v50 = vand.u32 2147483647, %v3480_v46  ;;  %v1349_v6 = vmax.f32 %v3459_v3, 0.0 }
 0x2dc   : > { %2797 = vpow2.f32 %v1387_v38  ;;  %v1391_v49 = vmul.f32 1.442695, %v1380_v45  ;;  %v1345_v29 = vmax.f32 %v3461_v5, 0.0  ;;  %v1350_v10 = vmax.f32 %v3463_v8, 0.0 }
 0x2dd   : > { %2799 = vpow2.f32 %v1389_v48  ;;  %v1384_v54 = vsub.f32 0.0, %v1376_v50  ;;  %v1346_v18 = vmax.f32 %v3466_v11, 0.0  ;;  %v1347_v34 = vmax.f32 %v3473_v36, 0.0 }
 0x2de   : > { %2801 = vpow2.f32 %v1391_v49  ;;  %v1351_v26 = vmax.f32 %v3471_v28, 0.0  ;;  %vm1353_vm11 = vcmp.ne.f32.partialorder %v3461_v5, %v3461_v5  ;;  %vm1354_vm12 = vcmp.ne.f32.partialorder %v3466_v11, %v3466_v11 }
 0x2df   : > { %2803 = vpow2.f32 %v1397_v33  ;;  %v1399_v62 = vmul.f32 1.442695, %v1384_v54  ;;  %v1348_v41 = vmax.f32 %v3475_v37, 0.0  ;;  %vm1357_vm0 = vcmp.ne.f32.partialorder %v3459_v3, %v3459_v3 }
 0x2e0   : > { %vm1358_vm3 = vcmp.ne.f32.partialorder %v3463_v8, %v3463_v8  ;;  %vm1355_vm6 = vcmp.ne.f32.partialorder %v3473_v36, %v3473_v36  ;;  %vm1356_vm7 = vcmp.ne.f32.partialorder %v3475_v37, %v3475_v37 }
 0x2e3   : > { %v2792_v52 = vpop.eup %2791 }
 0x2e4   : > { %v2794_v55 = vpop.eup %2793  ;;  %v1437_v56 = vadd.f32 1.0, %v2792_v52  ;;  %v1440_v0 = vmul.f32 -0.5, %v2792_v52  ;;  %v1443_v12 = vand.u32 2147483647, %v2792_v52 }
 0x2e5   : > { %v3483_v58 = vpop.eup %2795  ;;  %v1401_v59 = vadd.f32 1.0, %v2794_v55  ;;  %v1404_v1 = vmul.f32 -0.5, %v2794_v55  ;;  %v1407_v20 = vand.u32 2147483647, %v2794_v55 }
 0x2e6   : > { %v2798_v60 = vpop.eup %2797  ;;  %2805 = vlog2.f32 %v1437_v56  ;;  %v1446_v61 = vadd.f32 1.0, %v3483_v58  ;;  %v1449_v14 = vmul.f32 -0.5, %v3483_v58  ;;  %v1441_v22 = vadd.f32 1.0, %v1440_v0 }
 0x2e7   : > { %2807 = vlog2.f32 %v1401_v59  ;;  %v1410_v63 = vadd.f32 1.0, %v2798_v60  ;;  %v1413_v4 = vmul.f32 -0.5, %v2798_v60  ;;  %v3487_v9 = vpop.eup %2799  ;;  %v1405_v24 = vadd.f32 1.0, %v1404_v1 }
 0x2e8   : > { %2809 = vlog2.f32 %v1446_v61  ;;  %v3492_v16 = vpop.eup %2801  ;;  %v1419_v23 = vadd.f32 1.0, %v3487_v9  ;;  %v1416_v32 = vand.u32 2147483647, %v2798_v60  ;;  %vm3506_vm13 = vcmp.lt.f32.partialorder %v1443_v12, 0.0004427343 }
 0x2e9   : > { %2811 = vlog2.f32 %v1410_v63  ;;  %v3496_v31 = vpop.eup %2803  ;;  %v1428_v25 = vadd.f32 1.0, %v3492_v16  ;;  %v1414_v27 = vadd.f32 1.0, %v1413_v4  ;;  %v1450_v40 = vadd.f32 1.0, %v1449_v14 }
 0x2ea   : > { %2813 = vpow2.f32 %v1399_v62  ;;  %v1455_v35 = vadd.f32 1.0, %v3496_v31  ;;  %vm3511_vm14 = vcmp.lt.f32.partialorder %v1407_v20, 0.0004427343  ;;  %v1442_v44 = vmul.f32 %v2792_v52, %v1441_v22 }
 0x2eb   : > { %2815 = vlog2.f32 %v1419_v23  ;;  %v1422_v45 = vmul.f32 -0.5, %v3487_v9  ;;  %v1406_v49 = vmul.f32 %v2794_v55, %v1405_v24  ;;  %v1452_v33 = vand.u32 2147483647, %v3483_v58 }
 0x2ec   : > { %2817 = vlog2.f32 %v1428_v25  ;;  %v1415_v56 = vmul.f32 %v2798_v60, %v1414_v27  ;;  %vm3517_vm15 = vcmp.lt.f32.partialorder %v1416_v32, 0.0004427343  ;;  %v1431_v62 = vmul.f32 -0.5, %v3492_v16 }
 0x2ed   : > { %2819 = vlog2.f32 %v1455_v35  ;;  %v1451_v55 = vmul.f32 %v3483_v58, %v1450_v40  ;;  %v1458_v60 = vmul.f32 -0.5, %v3496_v31  ;;  %v1423_v4 = vadd.f32 1.0, %v1422_v45 }
 0x2ee   : > { %v1425_v12 = vand.u32 2147483647, %v3487_v9  ;;  %vm3538_vm5 = vcmp.lt.f32.partialorder %v1452_v33, 0.0004427343  ;;  %v1432_v25 = vadd.f32 1.0, %v1431_v62 }
 0x2ef   : > { %v1459_v32 = vadd.f32 1.0, %v1458_v60  ;;  %v1461_v35 = vand.u32 2147483647, %v3496_v31  ;;  %v1424_v40 = vmul.f32 %v3487_v9, %v1423_v4 }
 0x2f0   : > { %v2806_v38 = vpop.eup %2805  ;;  %vm3561_vm8 = vcmp.lt.f32.partialorder %v1425_v12, 0.0004427343 }
 0x2f1   : > { %v2808_v42 = vpop.eup %2807  ;;  %v1439_v50 = vmul.f32 0.6931472, %v2806_v38  ;;  %v1460_v33 = vmul.f32 %v3496_v31, %v1459_v32 }
 0x2f2   : > { %v2810_v47 = vpop.eup %2809  ;;  %v1403_v48 = vmul.f32 0.6931472, %v2808_v42 }
 0x2f3   : > { %v2812_v54 = vpop.eup %2811  ;;  %v1448_v61 = vmul.f32 0.6931472, %v2810_v47  ;;  %v1445_v22 = vsel %vm3506_vm13, %v1442_v44, %v1439_v50  ;;  %vm1359_vm13 = vcmp.ne.f32.partialorder %v3471_v28, %v3471_v28 }
 0x2f4   : > { %v3522_v63 = vpop.eup %2813  ;;  %v1409_v52 = vsel %vm3511_vm14, %v1406_v49, %v1403_v48  ;;  %v1412_v0 = vmul.f32 0.6931472, %v2812_v54  ;;  %v1477_v39 = vadd.f32 %v1445_v22, %v1349_v6  ;;  %v1433_v6 = vmul.f32 %v3492_v16, %v1432_v25 }
 0x2f5   : > { %v1473_v1 = vadd.f32 %v1409_v52, %v1345_v29  ;;  %v1464_v14 = vadd.f32 1.0, %v3522_v63  ;;  %v1434_v29 = vand.u32 2147483647, %v3492_v16  ;;  %v1454_v24 = vsel %vm3538_vm5, %v1451_v55, %v1448_v61  ;;  %v2816_v38 = vpop.eup %2815 }
 0x2f6   : > { %v1418_v20 = vsel %vm3517_vm15, %v1415_v56, %v1412_v0  ;;  %v1478_v44 = vadd.f32 %v1454_v24, %v1350_v10  ;;  %v1421_v45 = vmul.f32 0.6931472, %v2816_v38  ;;  %v1467_v47 = vmul.f32 -0.5, %v3522_v63 }
 0x2f7   : > { %v1474_v23 = vadd.f32 %v1418_v20, %v1346_v18  ;;  %2821 = vlog2.f32 %v1464_v14  ;;  %v1481_v27 = vsel %vm1353_vm11, %v3461_v5, %v1473_v1  ;;  %v2818_v5 = vpop.eup %2817  ;;  %vm1435_vm11 = vcmp.lt.f32.partialorder %v1434_v29, 0.0004427343 }
 0x2f8   : > { %v1489_v48 = vpack.c.bf16 %v1481_v27, %v1481_v27  ;;  %v1430_v49 = vmul.f32 0.6931472, %v2818_v5  ;;  %v1427_v9 = vsel %vm3561_vm8, %v1424_v40, %v1421_v45  ;;  %v1485_v10 = vsel %vm1357_vm0, %v3459_v3, %v1477_v39  ;;  %v2774_v45 = vld [vmem:[%s3255_s8 + $0x74] ss:$8 sps:$4 sm:$0xff]  }
 0x2f9   : > { %v1482_v18 = vsel %vm1354_vm12, %v3466_v11, %v1474_v23  ;;  %v2820_v11 = vpop.eup %2819  ;;  %vm1462_vm12 = vcmp.lt.f32.partialorder %v1461_v35, 0.0004427343  ;;  %v1475_v59 = vadd.f32 %v1427_v9, %v1347_v34  ;;  %v1486_v16 = vsel %vm1358_vm3, %v3463_v8, %v1478_v44  ;;  %v2769_v44 = vld [vmem:[%s3255_s8 + $0x60] ss:$8 sps:$4 sm:$0xff]  }
 0x2fa   : > { %v1490_v43 = vpack.c.bf16 %v1482_v18, %v1482_v18  ;;  %v1457_v50 = vmul.f32 0.6931472, %v2820_v11  ;;  %v1436_v56 = vsel %vm1435_vm11, %v1433_v6, %v1430_v49  ;;  %v1468_v62 = vadd.f32 1.0, %v1467_v47  ;;  %v2772_v47 = vld [vmem:[%s3255_s8 + $0x70] ss:$8 sps:$4 sm:$0xff]  }
 0x2fb   : > { %v1476_v61 = vadd.f32 %v1436_v56, %v1348_v41  ;;  %v1528_v52 = vunpack.c.l.b16 %v1489_v48  ;;  %v1483_v3 = vsel %vm1355_vm6, %v3473_v36, %v1475_v59  ;;  %v1470_v0 = vand.u32 2147483647, %v3522_v63 }
 0x2fc   : > { %v1529_v54 = vunpack.c.l.b16 %v1490_v43  ;;  %v1463_v31 = vsel %vm1462_vm12, %v1460_v33, %v1457_v50  ;;  %v1493_v55 = vpack.c.bf16 %v1485_v10, %v1485_v10  ;;  %v1491_v41 = vpack.c.bf16 %v1483_v3, %v1483_v3  ;;  %v2771_v43 = vld [vmem:[%s3255_s8 + $0x64] ss:$8 sps:$4 sm:$0xff]   ;;  %s3987_s8 = sld [smem:[#allocation15_spill]] }
 0x2fd   : > { %v1479_v34 = vadd.f32 %v1463_v31, %v1351_v26  ;;  %v1484_v8 = vsel %vm1356_vm7, %v3475_v37, %v1476_v61  ;;  %v1494_v4 = vpack.c.bf16 %v1486_v16, %v1486_v16  ;;  %v1469_v26 = vmul.f32 %v3522_v63, %v1468_v62  ;;  %1755 = vmatprep.subr.bf16.mxu1 %v2771_v43 }
 0x2fe   : > { %v1537_v1 = vsel %vm1536_vm4, %v1529_v54, %v1528_v52  ;;  %v1492_v36 = vpack.c.bf16 %v1484_v8, %v1484_v8  ;;  %v1530_v14 = vunpack.c.l.b16 %v1491_v41  ;;  %v1352_v29 = vmax.f32 %v3480_v46, 0.0  ;;  %1756 = vmatpush1.bf16.msra.mxu1 %v2769_v44 }
 0x2ff   : > { %v1487_v12 = vsel %vm1359_vm13, %v3471_v28, %v1479_v34  ;;  %vm1471_vm14 = vcmp.lt.f32.partialorder %v1470_v0, 0.0004427343  ;;  %vm1542_vm15 = vcmask 1044484   ;;  %v1532_v37 = vunpack.c.l.b16 %v1493_v55  ;;  %1757 = vmatprep.subr.bf16.mxu1 %v2774_v45 }
 0x300   : > { %v1495_v22 = vpack.c.bf16 %v1487_v12, %v1487_v12  ;;  %v1531_v58 = vunpack.c.l.b16 %v1492_v36  ;;  %v1539_v24 = vsel %vm1538_vm9, %v1530_v14, %v1537_v1  ;;  %vm1544_vm0 = vcmask 1045509  }
 0x301   : > { %v2822_v60 = vpop.eup %2821  ;;  %v1533_v25 = vunpack.c.l.b16 %v1494_v4  ;;  %vm1546_vm3 = vcmask 1046534   ;;  %vm1360_vm4 = vcmp.ne.f32.partialorder %v3480_v46, %v3480_v46  ;;  %vm1548_vm5 = vcmask 1047559  }
 0x302   : > { %v1466_v20 = vmul.f32 0.6931472, %v2822_v60  ;;  %v1541_v28 = vsel %vm1540_vm10, %v1531_v58, %v1539_v24  ;;  %v1534_v63 = vunpack.c.l.b16 %v1495_v22  ;;  %1758 = vmatpush1.bf16.msra.mxu1 %v2772_v47  ;;  %v1640_v11 = vstv %s816_s15 }
 0x303   : > { %v1543_v32 = vsel %vm1542_vm15, %v1532_v37, %v1541_v28  ;;  %v1642_v48 = vstv %s818_s22  ;;  %v1641_v6 = vmul.f32 %v1640_v11, %v3307_v53 }
 0x304   : > { %v1472_v23 = vsel %vm1471_vm14, %v1469_v26, %v1466_v20  ;;  %v1545_v38 = vsel %vm1544_vm0, %v1533_v25, %v1543_v32 }
 0x305   : > { %v1480_v27 = vadd.f32 %v1472_v23, %v1352_v29  ;;  %v1547_v39 = vsel %vm1546_vm3, %v1534_v63, %v1545_v38 }
 0x307   : > { %v1488_v35 = vsel %vm1360_vm4, %v3480_v46, %v1480_v27  ;;  %v2482_v46 = vld [vmem:[%s742_s25] ss:$0 sm:$0xff]  ;;  %s2512_s25 = sshll.u32 %s3987_s8, 7 }
 0x308   : > { %v1496_v18 = vpack.c.bf16 %v1488_v35, %v1488_v35  ;;  %s3628_s6 = scalar_lea.hbm %s3990_s5, %s2512_s25 }
 0x30a   : > { %v1535_v40 = vunpack.c.l.b16 %v1496_v18 }
 0x30c   : > { %v1549_v42 = vsel %vm1548_vm5, %v1535_v40, %v1547_v39 }
 0x30d   : > { %v1550_v5 = vpack.c.b16 %v1549_v42, %v1549_v42 }
 0x30f   : > { %2592 = vmatmul.mubr.bf16.vlgmr.msra.gmra.mrb[8].mxu0 %v1550_v5 }
 0x310   : > { %2597 = vmatprep.mubr.msk.bf16.mxu0 %vm1189_vm1, %v3326_v2 }
 0x3e2   : > { %v1634_v2 = vpop.f32.mrb[8].mxu0 }
 0x3e3   : > { %v1635_v49 = vadd.f32 %v2482_v46, %v1634_v2  ;;  %v2593_v9 = vpop.f32.mrb[9].mxu0 }
 0x3e4   : > { %v1637_v50 = vpop.f32.mrb[10].mxu0 }
 0x3e5   : > { %v1643_v33 = vmul.f32 %v1642_v48, %v1635_v49  ;;  %v2594_v54 = vpop.f32.mrb[11].mxu0 }
 0x3e7   : > { %v1644_v10 = vadd.f32 %v1643_v33, %v1641_v6 }
 0x3e9   : > { %v1646_v56 = vpack.c.bf16 %v1644_v10, %v1644_v10  ;;  %1645 = vst [vmem:[%s3261_s2] sm:$0xff] %v1644_v10 }
 0x3eb   : > { %1776 = vmatmul.mubr.bf16.vlgmr.msra.gmra.mrb[8].mxu1 %v1646_v56 }
 0x4be   : > { %v1777_v59 = vpop.f32.mrb[8].mxu1 }
 0x4bf   : > { %v1779_v16 = vpop.f32.mrb[9].mxu1 }
 0x4c0   : > { %v1874_v61 = vpack.c.bf16 %v1779_v16, %v1779_v16  ;;  %v1781_v31 = vpop.f32.mrb[10].mxu1 }
 0x4c1   : > { %v1782_v62 = vpop.f32.mrb[11].mxu1 }
 0x4c2   : > { %v1876_v52 = vsel %vm1196_vm2, %v1874_v61, 0  ;;  %2602 = vmatprep.subr.msk.bf16.mxu0 %vm1196_vm2, %v1874_v61 }
 0x4c3   : > { %2596 = vmatpush3.bf16.msra.mxu0 %v1876_v52 }
 0x4c6   : > { %2598 = vmatmul.mubr.msk.bf16.vlgmr.msra.gmra.mrb[12].mxu0 %vm1189_vm1, %v3337_v13 }
 0x4c7   : > { %2887 = shalt.err (!%p2884_p5)
}
 0x4c8   : > { %s2888_s2 = scalar_lea.hbm %s3628_s6, 128  ;;  %s2892_s24 = scalar_lea.hbm %s3990_s5, 256 }
 0x4c9   : > { %p2889_p6 = scmp.ne.s32.totalorder %s3628_s6, %s2888_s2  ;;  %p2893_p9 = scmp.lt.u32.totalorder %s3628_s6, %s3990_s5 }
 0x4ca   : > { %p2894_p10 = scmp.lt.u32.totalorder %s2892_s24, %s2888_s2  ;;  %p2896_p12 = scmp.lt.u32.totalorder %s2888_s2, %s3628_s6 }
 0x4cb   : > { %p2890_p7 = pnand %p2889_p6, %p3154_p3 }
 0x4cc   : > { %p2895_p11 = por %p2894_p10, %p2893_p9 }
 0x4cd   : > { %p2891_p8 = pneg %p2890_p7 }
 0x4ce   : > { %p2897_p13 = por %p2896_p12, %p2895_p11 }
 0x4d0   : > { %p2898_p0 = pnand %p2897_p13, %p2891_p8 }
 0x4d2   : > { %2901 = shalt.err (!%p2898_p0)
}
 0x4d3   : > { %2607 = dma.vmem_to_hbm [thread:$0]  (%p3154_p3), %s2176_s7, 128, %s3628_s6, %s2157_s9   ;;  %v3012_v53 = vmov 1966171168   ;;  %v1789_v3 = vlaneseq  ;;  %v1785_v8 = vcombine.high %v1777_v59, %v1777_v59  ;;  %v1951_v23 = vcombine.high %v3342_v15, %v3342_v15  ;;  %v2509_v27 = vld [vmem:[%s750_s20] ss:$0 sm:$0xff] }
 0x4d4   : > { %v1787_v13 = vunpack.c.l.s4 %v3012_v53  ;;  %v1953_v24 = vcombine.high %v3346_v19, %v3346_v19  ;;  %v1974_v43 = vcombine.high %v2509_v27, %v2509_v27  ;;  %s2524_s14 = sshll.u32 %s3987_s8, 9  ;;  %s2188_s20 = sshll.u32 %s3263_s30, 4  ;;  %s3835_s20 = int_to_ptr.vmem [resolvable:$true] %s2188_s20 }
 0x4d5   : > { %v1790_v34 = vshrl.u32 %v1789_v3, 7  ;;  %v1954_v3 = vcombine.high %v3348_v21, %v3348_v21  ;;  %s4004_s27 = sld [smem:[#allocation37_spill]]  ;;  %s2162_s7 = scalar_lea.sflag [#allocation8], %s3988_s26 }
 0x4d6   : > { %v1788_v0 = vunpack.c.0.s8 %v1787_v13  ;;  %s2902_s9 = scalar_lea.vmem %s3835_s20, 512  ;;  %s3013_s8 = smov [#allocation7]  }
 0x4d7   : > { %v1836_v26 = vsub.s32 0, %v1790_v34  ;;  %p2903_p1 = scmp.ne.s32.totalorder %s3835_s20, %s2902_s9  ;;  %s2906_s29 = sshll.u32 %s3013_s8, 4  ;;  %s2907_s29 = int_to_ptr.vmem [resolvable:$false] %s2906_s29 }
 0x4d8   : > { %v1791_v55 = vsub.s32 %v1788_v0, %v1790_v34  ;;  %s2908_s4 = scalar_lea.vmem %s2907_s29, 1024  ;;  %p2909_p5 = scmp.lt.s32.totalorder %s3835_s20, %s2907_s29 }
 0x4d9   : > { %p2904_p2 = pnand %p2903_p1, %p3154_p3  ;;  %p2910_p6 = scmp.lt.s32.totalorder %s2908_s4, %s2902_s9 }
 0x4da   : > { %v1792_v41 = vrot.slane %v1777_v59, %v1791_v55  ;;  %v1799_v60 = vrot.slane %v1785_v8, %v1791_v55 }
 0x4db   : > { %s4005_s6 = smov %s4004_s27  ;;  %s3833_s23 = scalar_lea.hbm %s4004_s27, %s2524_s14 }
 0x4dc   : > { %v1800_v1 = vcombine.high %v1792_v41, %v1792_v41  ;;  %v1801_v4 = vcombine.high %v1799_v60, %v1799_v60  ;;  %v1808_v36 = vrot.slane %v1792_v41, %v1791_v55  ;;  %v1815_v14 = vrot.slane %v1799_v60, %v1791_v55  ;;  %p2905_p4 = pneg %p2904_p2  ;;  %p2911_p7 = por %p2910_p6, %p2909_p5 }
 0x4de   : > { %v1822_v12 = vrot.slane %v1800_v1, %v1791_v55  ;;  %v1829_v20 = vrot.slane %v1801_v4, %v1791_v55  ;;  %v1830_v22 = vcombine.high %v1808_v36, %v1808_v36  ;;  %v1831_v58 = vcombine.high %v1815_v14, %v1815_v14  ;;  %p2912_p8 = pnand %p2911_p7, %p2905_p4 }
 0x4df   : > { %v1853_v25 = vrot.slane %v1815_v14, %v1836_v26  ;;  %v1837_v32 = vrot.slane %v1808_v36, %v1836_v26  ;;  %v1952_v55 = vcombine.high %v3344_v17, %v3344_v17 }
 0x4e0   : > { %v1832_v29 = vcombine.high %v1822_v12, %v1822_v12  ;;  %v1833_v37 = vcombine.high %v1829_v20, %v1829_v20  ;;  %v1857_v28 = vrot.slane %v1829_v20, %v1836_v26  ;;  %v1841_v35 = vrot.slane %v1822_v12, %v1836_v26 }
 0x4e1   : > { %v1845_v38 = vrot.slane %v1830_v22, %v1836_v26  ;;  %v1861_v42 = vrot.slane %v1831_v58, %v1836_v26 }
 0x4e2   : > { %v1849_v5 = vrot.slane %v1832_v29, %v1836_v26  ;;  %v1865_v47 = vrot.slane %v1833_v37, %v1836_v26 }
 0x599   : > { %v2599_v63 = vpop.f32.mrb[12].mxu0 }
 0x59a   : > { %v1933_v18 = vcombine.high %v2599_v63, %v2599_v63  ;;  %v1943_v39 = vadd.f32 %v2599_v63, %v1853_v25  ;;  %v1912_v40 = vpop.f32.mrb[13].mxu0 }
 0x59b   : > { %v1931_v44 = vcombine.high %v1912_v40, %v1912_v40  ;;  %v1939_v45 = vadd.f32 %v1912_v40, %v1837_v32  ;;  %v2600_v46 = vpop.f32.mrb[14].mxu0 }
 0x59c   : > { %v1944_v11 = vadd.f32 %v1933_v18, %v1857_v28  ;;  %v1963_v2 = vadd.f32 %v1943_v39, %v3346_v19  ;;  %v1934_v48 = vcombine.high %v2600_v46, %v2600_v46  ;;  %v1945_v49 = vadd.f32 %v2600_v46, %v1861_v42  ;;  %v1915_v6 = vpop.f32.mrb[15].mxu0 }
 0x59d   : > { %v1940_v9 = vadd.f32 %v1931_v44, %v1841_v35  ;;  %v1959_v50 = vadd.f32 %v1939_v45, %v3342_v15  ;;  %v1932_v33 = vcombine.high %v1915_v6, %v1915_v6  ;;  %v1941_v54 = vadd.f32 %v1915_v6, %v1845_v38 }
 0x59e   : > { %v1964_v10 = vadd.f32 %v1953_v24, %v1944_v11  ;;  %v3660_v56 = vadd.f32 %v2509_v27, %v1963_v2  ;;  %v1946_v59 = vadd.f32 %v1934_v48, %v1865_v47  ;;  %v1965_v16 = vadd.f32 %v1945_v49, %v3348_v21 }
 0x59f   : > { %v1960_v61 = vadd.f32 %v1951_v23, %v1940_v9  ;;  %v3663_v31 = vadd.f32 %v2509_v27, %v1959_v50  ;;  %v1942_v62 = vadd.f32 %v1932_v33, %v1849_v5  ;;  %v1961_v19 = vadd.f32 %v1941_v54, %v3344_v17 }
 0x5a0   : > { %v3666_v52 = vadd.f32 %v1974_v43, %v1964_v10  ;;  %v2012_v53 = vand.u32 2147483647, %v3660_v56  ;;  %v1966_v4 = vadd.f32 %v1954_v3, %v1946_v59  ;;  %v3678_v36 = vadd.f32 %v2509_v27, %v1965_v16 }
 0x5a1   : > { %v3669_v13 = vadd.f32 %v1974_v43, %v1960_v61  ;;  %v2008_v15 = vand.u32 2147483647, %v3663_v31  ;;  %v1962_v20 = vadd.f32 %v1952_v55, %v1942_v62  ;;  %v3682_v22 = vadd.f32 %v2509_v27, %v1961_v19 }
 0x5a2   : > { %v2013_v0 = vand.u32 2147483647, %v3666_v52  ;;  %v2020_v34 = vsub.f32 0.0, %v2012_v53  ;;  %v3680_v21 = vadd.f32 %v1974_v43, %v1966_v4  ;;  %v2014_v17 = vand.u32 2147483647, %v3678_v36 }
 0x5a3   : > { %v2009_v8 = vand.u32 2147483647, %v3669_v13  ;;  %v2016_v41 = vsub.f32 0.0, %v2008_v15  ;;  %v3686_v23 = vadd.f32 %v1974_v43, %v1962_v20  ;;  %v2010_v25 = vand.u32 2147483647, %v3682_v22 }
 0x5a4   : > { %v2021_v60 = vsub.f32 0.0, %v2013_v0  ;;  %v2032_v1 = vmul.f32 1.442695, %v2020_v34  ;;  %v2015_v29 = vand.u32 2147483647, %v3680_v21  ;;  %v2022_v37 = vsub.f32 0.0, %v2014_v17 }
 0x5a5   : > { %v2017_v12 = vsub.f32 0.0, %v2009_v8  ;;  %v2024_v14 = vmul.f32 1.442695, %v2016_v41  ;;  %v2011_v63 = vand.u32 2147483647, %v3686_v23  ;;  %v2018_v27 = vsub.f32 0.0, %v2010_v25 }
 0x5a6   : > { %2823 = vpow2.f32 %v2032_v1  ;;  %v2034_v26 = vmul.f32 1.442695, %v2021_v60  ;;  %v2023_v24 = vsub.f32 0.0, %v2015_v29  ;;  %v2036_v28 = vmul.f32 1.442695, %v2022_v37 }
 0x5a7   : > { %2825 = vpow2.f32 %v2024_v14  ;;  %v2026_v58 = vmul.f32 1.442695, %v2017_v12  ;;  %v2019_v35 = vsub.f32 0.0, %v2011_v63  ;;  %v2028_v38 = vmul.f32 1.442695, %v2018_v27 }
 0x5a8   : > { %2827 = vpow2.f32 %v2034_v26  ;;  %v2038_v32 = vmul.f32 1.442695, %v2023_v24  ;;  %v1988_v11 = vmax.f32 %v3660_v56, 0.0  ;;  %v1984_v48 = vmax.f32 %v3663_v31, 0.0 }
 0x5a9   : > { %2829 = vpow2.f32 %v2026_v58  ;;  %v2030_v18 = vmul.f32 1.442695, %v2019_v35  ;;  %v1989_v9 = vmax.f32 %v3666_v52, 0.0  ;;  %v1985_v33 = vmax.f32 %v3669_v13, 0.0 }
 0x5aa   : > { %2831 = vpow2.f32 %v2036_v28  ;;  %v1990_v19 = vmax.f32 %v3678_v36, 0.0  ;;  %v1991_v53 = vmax.f32 %v3680_v21, 0.0  ;;  %v1986_v55 = vmax.f32 %v3682_v22, 0.0 }
 0x5ab   : > { %2833 = vpow2.f32 %v2038_v32  ;;  %v1987_v60 = vmax.f32 %v3686_v23, 0.0  ;;  %vm1996_vm1 = vcmp.ne.f32.partialorder %v3660_v56, %v3660_v56  ;;  %vm1997_vm2 = vcmp.ne.f32.partialorder %v3666_v52, %v3666_v52 }
 0x5ac   : > { %2835 = vpow2.f32 %v2028_v38  ;;  %vm1992_vm9 = vcmp.ne.f32.partialorder %v3663_v31, %v3663_v31  ;;  %vm1993_vm10 = vcmp.ne.f32.partialorder %v3669_v13, %v3669_v13  ;;  %vm1998_vm12 = vcmp.ne.f32.partialorder %v3678_v36, %v3678_v36 }
 0x5ad   : > { %2837 = vpow2.f32 %v2030_v18  ;;  %vm1999_vm13 = vcmp.ne.f32.partialorder %v3680_v21, %v3680_v21  ;;  %vm1994_vm4 = vcmp.ne.f32.partialorder %v3682_v22, %v3682_v22  ;;  %vm1995_vm5 = vcmp.ne.f32.partialorder %v3686_v23, %v3686_v23 }
 0x5b0   : > { %v2824_v39 = vpop.eup %2823 }
 0x5b1   : > { %v2826_v40 = vpop.eup %2825  ;;  %v2076_v42 = vadd.f32 1.0, %v2824_v39  ;;  %v2079_v47 = vmul.f32 -0.5, %v2824_v39  ;;  %v2082_v50 = vand.u32 2147483647, %v2824_v39 }
 0x5b2   : > { %v2828_v5 = vpop.eup %2827  ;;  %v2040_v43 = vadd.f32 1.0, %v2826_v40  ;;  %v2043_v49 = vmul.f32 -0.5, %v2826_v40  ;;  %v2046_v16 = vand.u32 2147483647, %v2826_v40 }
 0x5b3   : > { %v3690_v44 = vpop.eup %2829  ;;  %2839 = vlog2.f32 %v2076_v42  ;;  %v2085_v45 = vadd.f32 1.0, %v2828_v5  ;;  %v2088_v2 = vmul.f32 -0.5, %v2828_v5  ;;  %v2080_v10 = vadd.f32 1.0, %v2079_v47 }
 0x5b4   : > { %2841 = vlog2.f32 %v2040_v43  ;;  %v2049_v46 = vadd.f32 1.0, %v3690_v44  ;;  %v3695_v6 = vpop.eup %2831  ;;  %v2091_v59 = vand.u32 2147483647, %v2828_v5  ;;  %v2052_v62 = vmul.f32 -0.5, %v3690_v44 }
 0x5b5   : > { %2843 = vlog2.f32 %v2085_v45  ;;  %v3699_v54 = vpop.eup %2833  ;;  %v2094_v61 = vadd.f32 1.0, %v3695_v6  ;;  %v2089_v0 = vadd.f32 1.0, %v2088_v2  ;;  %v2044_v34 = vadd.f32 1.0, %v2043_v49 }
 0x5b6   : > { %2845 = vlog2.f32 %v2049_v46  ;;  %v2103_v15 = vadd.f32 1.0, %v3699_v54  ;;  %v3706_v3 = vpop.eup %2835  ;;  %v2097_v41 = vmul.f32 -0.5, %v3695_v6  ;;  %v2081_v4 = vmul.f32 %v2824_v39, %v2080_v10 }
 0x5b7   : > { %2847 = vlog2.f32 %v2094_v61  ;;  %v3709_v8 = vpop.eup %2837  ;;  %v2058_v1 = vadd.f32 1.0, %v3706_v3  ;;  %vm3718_vm6 = vcmp.lt.f32.partialorder %v2082_v50, 0.0004427343  ;;  %vm3722_vm7 = vcmp.lt.f32.partialorder %v2091_v59, 0.0004427343 }
 0x5b8   : > { %2849 = vlog2.f32 %v2103_v15  ;;  %vm3726_vm8 = vcmp.lt.f32.partialorder %v2046_v16, 0.0004427343  ;;  %v2053_v58 = vadd.f32 1.0, %v2052_v62  ;;  %v2055_v17 = vand.u32 2147483647, %v3690_v44 }
 0x5b9   : > { %2851 = vlog2.f32 %v2058_v1  ;;  %v2067_v29 = vadd.f32 1.0, %v3709_v8  ;;  %v2090_v25 = vmul.f32 %v2828_v5, %v2089_v0  ;;  %v2045_v28 = vmul.f32 %v2826_v40, %v2044_v34 }
 0x5ba   : > { %v2106_v63 = vmul.f32 -0.5, %v3699_v54  ;;  %v2098_v35 = vadd.f32 1.0, %v2097_v41  ;;  %v2100_v38 = vand.u32 2147483647, %v3695_v6  ;;  %v2109_v42 = vand.u32 2147483647, %v3699_v54 }
 0x5bb   : > { %2853 = vlog2.f32 %v2067_v29  ;;  %v2061_v5 = vmul.f32 -0.5, %v3706_v3  ;;  %v2054_v47 = vmul.f32 %v3690_v44, %v2053_v58  ;;  %vm3745_vm11 = vcmp.lt.f32.partialorder %v2055_v17, 0.0004427343 }
 0x5bc   : > { %v2070_v50 = vmul.f32 -0.5, %v3709_v8  ;;  %v2099_v59 = vmul.f32 %v3695_v6, %v2098_v35  ;;  %vm3759_vm14 = vcmp.lt.f32.partialorder %v2100_v38, 0.0004427343  ;;  %vm3765_vm15 = vcmp.lt.f32.partialorder %v2109_v42, 0.0004427343  ;;  %v2856_v35 = vld [vmem:[%s3263_s30] sm:$0xff] }
 0x5bd   : > { %v2840_v26 = vpop.eup %2839  ;;  %v2062_v0 = vadd.f32 1.0, %v2061_v5  ;;  %v2073_v58 = vand.u32 2147483647, %v3709_v8 }
 0x5be   : > { %v2842_v37 = vpop.eup %2841  ;;  %v2078_v24 = vmul.f32 0.6931472, %v2840_v26  ;;  %v2071_v20 = vadd.f32 1.0, %v2070_v50 }
 0x5bf   : > { %v2844_v32 = vpop.eup %2843  ;;  %v2042_v27 = vmul.f32 0.6931472, %v2842_v37  ;;  %vm2074_vm3 = vcmp.lt.f32.partialorder %v2073_v58, 0.0004427343 }
 0x5c0   : > { %v2084_v18 = vsel %vm3718_vm6, %v2081_v4, %v2078_v24  ;;  %v2087_v39 = vmul.f32 0.6931472, %v2844_v32  ;;  %v2846_v43 = vpop.eup %2845 }
 0x5c1   : > { %v2116_v45 = vadd.f32 %v2084_v18, %v1988_v11  ;;  %v2048_v40 = vsel %vm3726_vm8, %v2045_v28, %v2042_v27  ;;  %v2051_v49 = vmul.f32 0.6931472, %v2846_v43  ;;  %v2107_v11 = vadd.f32 1.0, %v2106_v63  ;;  %v2848_v61 = vpop.eup %2847  ;;  %v2855_v28 = vld [vmem:[%s3263_s30 + $0x10] sm:$0xff] }
 0x5c2   : > { %v2093_v2 = vsel %vm3722_vm7, %v2090_v25, %v2087_v39  ;;  %v2112_v44 = vadd.f32 %v2048_v40, %v1984_v48  ;;  %v2850_v34 = vpop.eup %2849  ;;  %v2096_v1 = vmul.f32 0.6931472, %v2848_v61  ;;  %v2063_v25 = vmul.f32 %v3706_v3, %v2062_v0 }
 0x5c3   : > { %v2117_v10 = vadd.f32 %v2093_v2, %v1989_v9  ;;  %v2057_v62 = vsel %vm3745_vm11, %v2054_v47, %v2051_v49  ;;  %v2064_v9 = vand.u32 2147483647, %v3706_v3  ;;  %v2124_v48 = vsel %vm1996_vm1, %v3660_v56, %v2116_v45  ;;  %v2852_v26 = vpop.eup %2851 }
 0x5c4   : > { %v2113_v41 = vadd.f32 %v2057_v62, %v1985_v33  ;;  %v2105_v12 = vmul.f32 0.6931472, %v2850_v34  ;;  %v2108_v14 = vmul.f32 %v3699_v54, %v2107_v11  ;;  %v2120_v56 = vsel %vm1992_vm9, %v3663_v31, %v2112_v44 }
 0x5c5   : > { %v2125_v6 = vsel %vm1997_vm2, %v3666_v52, %v2117_v10  ;;  %v2102_v33 = vsel %vm3759_vm14, %v2099_v59, %v2096_v1  ;;  %v2854_v37 = vpop.eup %2853  ;;  %v2060_v24 = vmul.f32 0.6931472, %v2852_v26  ;;  %vm2065_vm0 = vcmp.lt.f32.partialorder %v2064_v9, 0.0004427343 }
 0x5c6   : > { %v2138_v4 = vcombine.low %v2124_v48, %v2125_v6  ;;  %v2121_v52 = vsel %vm1993_vm10, %v3669_v13, %v2113_v41  ;;  %v2111_v29 = vsel %vm3765_vm15, %v2108_v14, %v2105_v12  ;;  %v2118_v31 = vadd.f32 %v2102_v33, %v1990_v19 }
 0x5c7   : > { %v2136_v17 = vcombine.low %v2120_v56, %v2121_v52  ;;  %v2119_v13 = vadd.f32 %v2111_v29, %v1991_v53  ;;  %v2069_v32 = vmul.f32 0.6931472, %v2854_v37  ;;  %v2072_v27 = vmul.f32 %v3709_v8, %v2071_v20 }
 0x5c8   : > { %v2146_v54 = vmul.f32 %v2138_v4, %v3425_v51  ;;  %v2126_v19 = vsel %vm1998_vm12, %v3678_v36, %v2118_v31  ;;  %v2066_v3 = vsel %vm2065_vm0, %v2063_v25, %v2060_v24 }
 0x5c9   : > { %v2144_v63 = vmul.f32 %v2136_v17, %v3433_v57  ;;  %v2127_v53 = vsel %vm1999_vm13, %v3680_v21, %v2119_v13  ;;  %v2075_v38 = vsel %vm2074_vm3, %v2072_v27, %v2069_v32  ;;  %v2114_v18 = vadd.f32 %v2066_v3, %v1986_v55  ;;  %v2857_v55 = vld [vmem:[%s3263_s30 + $0x18] sm:$0xff] }
 0x5ca   : > { %v2150_v51 = vadd.f32 %v2855_v28, %v2146_v54  ;;  %v2139_v8 = vcombine.low %v2126_v19, %v2127_v53  ;;  %v2115_v36 = vadd.f32 %v2075_v38, %v1987_v60 }
 0x5cb   : > { %v2148_v57 = vadd.f32 %v2856_v35, %v2144_v63  ;;  %v2122_v39 = vsel %vm1994_vm4, %v3682_v22, %v2114_v18  ;;  %v2858_v22 = vld [vmem:[%s3263_s30 + $0x8] sm:$0xff] }
 0x5cc   : > { %2154 = vst [vmem:[%s3263_s30 + $0x10] sm:$0xff] %v2150_v51  ;;  %v2147_v21 = vmul.f32 %v2139_v8, %v3441_v7  ;;  %v2123_v42 = vsel %vm1995_vm5, %v3686_v23, %v2115_v36 }
 0x5cd   : > { %2152 = vst [vmem:[%s3263_s30] sm:$0xff] %v2148_v57  ;;  %v2137_v60 = vcombine.low %v2122_v39, %v2123_v42 }
 0x5ce   : > { %v2151_v5 = vadd.f32 %v2857_v55, %v2147_v21 }
 0x5cf   : > { %v2145_v7 = vmul.f32 %v2137_v60, %v3448_v30 }
 0x5d0   : > { %2155 = vst [vmem:[%s3263_s30 + $0x18] sm:$0xff] %v2151_v5 }
 0x5d1   : > { %v2149_v23 = vadd.f32 %v2858_v22, %v2145_v7 }
 0x5d3   : > { %2153 = vst [vmem:[%s3263_s30 + $0x8] sm:$0xff] %v2149_v23 }
 0x5d4   : > { %2915 = shalt.err (!%p2912_p8)
}
 0x5d5   : > { %s2916_s30 = scalar_lea.hbm %s3833_s23, 512  ;;  %s2920_s2 = scalar_lea.hbm %s4005_s6, 1024 }
 0x5d6   : > { %p2917_p9 = scmp.ne.s32.totalorder %s3833_s23, %s2916_s30  ;;  %p2921_p12 = scmp.lt.u32.totalorder %s3833_s23, %s4005_s6 }
 0x5d7   : > { %p2922_p13 = scmp.lt.u32.totalorder %s2920_s2, %s2916_s30  ;;  %p2924_p1 = scmp.lt.u32.totalorder %s2916_s30, %s3833_s23 }
 0x5d8   : > { %p2918_p10 = pnand %p2917_p9, %p3154_p3 }
 0x5d9   : > { %p2923_p0 = por %p2922_p13, %p2921_p12 }
 0x5da   : > { %p2919_p11 = pneg %p2918_p10 }
 0x5db   : > { %p2925_p2 = por %p2924_p1, %p2923_p0 }
 0x5dd   : > { %p2926_p4 = pnand %p2925_p2, %p2919_p11 }
 0x5df   : > { %2929 = shalt.err (!%p2926_p4)
}
 0x5e0   : > { %s3014_s24 = smov 128   ;;  %s3015_s3 = smov 8  }
 0x5e1   : > { %2608 = dma.vmem_to_hbm [thread:$0]  (%p3154_p3), %s3835_s20, 512, %s3833_s23, %s2162_s7, %s3014_s24, %s3014_s24, %s3015_s3  }
 0x5e2 PF: > { %s4006_s21 = sld [smem:[#allocation18_spill]]  ;;  %s4007_s15 = sld [smem:[#allocation12_spill]] }
 0x5e3   : > { %s4008_s22 = sld [smem:[#allocation22_spill]] }
 0x5e8   : > { %p2624_p5 = scmp.ge.s32.totalorder %s4006_s21, 2  ;;  %s2203_s1 = sand.u32 1, %s4007_s15  }
 0x5e9   : > { %p4009_p6 = scmp.ne.s32.totalorder %s4008_s22, 0  ;;  %s2204_s14 = scalar_lea.sflag [#allocation4], %s2203_s1 }
 0x5eb   : > { %p2616_p7 = pnand %p2624_p5, %p4009_p6 }
 0x5ed   : > { %2967 = dma.done.wait (!%p2616_p7), %s2204_s14, 128  }
 0x5ee   : > { %2969 = vsyncadd (!%p2616_p7), %s2204_s14, 4294967168  ;;  %s2213_s17 = scalar_lea.sflag [#allocation8], %s2203_s1 }
 0x5ef   : > { %2971 = dma.done.wait (!%p2616_p7), %s2213_s17, 512  }
 0x5f0   : > { %2973 = vsyncadd (!%p2616_p7), %s2213_s17, 4294966784  ;;  %s35_s1 = sadd.s32 1, %s4006_s21   ;;  %s4010_s23 = sld [smem:[#allocation13_spill]] }
 0x5f1   : > { %p32_p8 = scmp.ge.s32.totalorder %s35_s1, 8   ;;  %s4011_s24 = sld [smem:[#allocation14_spill]] }
 0x5f2   : > { %s4012_s25 = sld [smem:[#allocation23_spill]]  ;;  %s4013_s26 = sld [smem:[#allocation16_spill]] }
 0x5f3   : > { %s4014_s27 = sld [smem:[#allocation17_spill]]  ;;  %s4015_s28 = sld [smem:[#allocation19_spill]] }
 0x5f4   : > { %s4016_s29 = sld [smem:[#allocation21_spill]]  ;;  %34 = sbr.rel (!%p32_p8) target bundleno = 22 (0x16), region = 174 }
 0x5fb   :  { %2218 = vsyncpa [#allocation4], 1 }
 0x5fc   :  { %2220 = vsyncpa [#allocation4 + $0x1], 1 }
 0x5fd   :  { %2221 = vsyncpa [#allocation8], 1 }
 0x5fe   :  { %2223 = vsyncpa [#allocation8 + $0x1], 1 }
 0x5ff   :  { %2224 = vsyncpa [#allocation5], 1 }
 0x600   :  { %2226 = vsyncpa [#allocation5 + $0x1], 1 }

</bundles_post_ra>
